<compile_context>
chip_gen: v6e
topology: v6e:2x2x1
jax: 0.10.0
libtpu: 0.0.40
codegen_flags: <defaults>
</compile_context>

<pallas_src>
import math

import jax
import jax.numpy as jnp
from jax.experimental import pallas as pl
from jax.experimental.pallas import tpu as pltpu

HIDDEN = 300   # hidden width from the PyTorch module
LANE = 128
HP = 384       # hidden padded to 3 * 128 lanes


def _pad_to(n, m):
    return ((n + m - 1) // m) * m


def encoder_kernel(x_ref, w1_ref, b1_ref, w2_ref, b2_ref, wfc_ref, bfc_ref,
                   out_ref):
    """Fused encoder: two GatedDense layers + final linear.

    x arrives already in bf16 (wrapper cast).  w1/w2 are the fused [Wh | Wg]
    weights (lane-dense, 2*HP wide); a static, 128-aligned slice splits the
    result before the sigmoid gate, so no cross-lane shuffles are needed.
    """
    x = x_ref[...]

    # GatedDense 1: (TM, D) @ (D, 2*HP) on the MXU, f32 accumulate.
    hg1 = jnp.dot(x, w1_ref[...], preferred_element_type=jnp.float32) + b1_ref[...]
    a1 = (hg1[:, :HP] * jax.nn.sigmoid(hg1[:, HP:])).astype(jnp.bfloat16)

    # GatedDense 2: (TM, HP) @ (HP, 2*HP)
    hg2 = jnp.dot(a1, w2_ref[...], preferred_element_type=jnp.float32) + b2_ref[...]
    a2 = (hg2[:, :HP] * jax.nn.sigmoid(hg2[:, HP:])).astype(jnp.bfloat16)

    # Final linear (no activation): (TM, HP) @ (HP, NZP) — lane-dense store.
    z = jnp.dot(a2, wfc_ref[...], preferred_element_type=jnp.float32) + bfc_ref[...]
    out_ref[...] = z.astype(out_ref.dtype)


def make_params(key, in_dim, hidden, n_z):
    """Deterministic He-style init, raw (unpadded, f32) parameter set."""
    ks = jax.random.split(key, 5)

    def he(k, fan_in, fan_out):
        std = jnp.sqrt(2.0 / fan_in)
        return jax.random.normal(k, (fan_in, fan_out), jnp.float32) * std

    return {
        "wh1": he(ks[0], in_dim, hidden), "bh1": jnp.zeros((1, hidden), jnp.float32),
        "wg1": he(ks[1], in_dim, hidden), "bg1": jnp.zeros((1, hidden), jnp.float32),
        "wh2": he(ks[2], hidden, hidden), "bh2": jnp.zeros((1, hidden), jnp.float32),
        "wg2": he(ks[3], hidden, hidden), "bg2": jnp.zeros((1, hidden), jnp.float32),
        "wfc": he(ks[4], hidden, n_z),    "bfc": jnp.zeros((1, n_z), jnp.float32),
    }


def pack_params(p, in_dim, n_z):
    """Zero-pad to lane multiples, fuse Wh|Wg per gated layer, cast W to bf16.

    Zero-padding is numerically exact: padded gate lanes give sigmoid(0)*0 = 0
    and padded K rows contribute nothing to the dot products.
    """
    nzp = _pad_to(max(n_z, LANE), LANE)

    def pad_w(w, rows, cols):
        return jnp.pad(w, ((0, rows - w.shape[0]), (0, cols - w.shape[1])))

    def pad_b(b, cols):
        return jnp.pad(b, ((0, 0), (0, cols - b.shape[1])))

    w1 = jnp.concatenate([pad_w(p["wh1"], in_dim, HP), pad_w(p["wg1"], in_dim, HP)], axis=1)
    b1 = jnp.concatenate([pad_b(p["bh1"], HP), pad_b(p["bg1"], HP)], axis=1)
    w2 = jnp.concatenate([pad_w(p["wh2"], HP, HP), pad_w(p["wg2"], HP, HP)], axis=1)
    b2 = jnp.concatenate([pad_b(p["bh2"], HP), pad_b(p["bg2"], HP)], axis=1)
    wfc = pad_w(p["wfc"], HP, nzp)
    bfc = pad_b(p["bfc"], nzp)
    return {
        "w1": w1.astype(jnp.bfloat16),  "b1": b1.astype(jnp.float32),
        "w2": w2.astype(jnp.bfloat16),  "b2": b2.astype(jnp.float32),
        "wfc": wfc.astype(jnp.bfloat16), "bfc": bfc.astype(jnp.float32),
    }


def choose_block_b(B):
    """Pick a batch block.

    * B <= 512 : single fused call — zero grid/pipeline overhead.
    * B  > 512 : blocks of at most 512 rows (amortizes ~0.35 us/step grid
      overhead on single-TC v5e/v6e) while guaranteeing >= 2 grid steps so
      both v7x TensorCores have work.  Blocks are multiples of 128, which
      satisfies the (16, 128) bf16 tiling requirement.
    """
    if B <= 512:
        return None
    return int(min(512, _pad_to(pl.cdiv(B, 2), 128)))


def encoder_forward(x, packed, n_z, *, block_b="auto"):
    """x: (B, D) f32.  Returns (B, n_z) f32."""
    B, D = x.shape
    nzp = packed["bfc"].shape[1]
    hp2 = packed["b1"].shape[1]

    if block_b == "auto":
        block_b = choose_block_b(B)

    # Wrapper-side bf16 cast: halves the activation DMA into the kernel and
    # removes a per-row VPU cast from the kernel's critical path.
    xb = x.astype(jnp.bfloat16)

    flops = 2 * B * (D * hp2 + HP * hp2 + HP * nzp)
    transcendentals = 2 * B * HP
    weight_bytes = sum(int(packed[k].size) * packed[k].dtype.itemsize
                       for k in ("w1", "w2", "wfc"))
    bias_bytes = sum(int(packed[k].size) * 4 for k in ("b1", "b2", "bfc"))
    bytes_accessed = int(xb.size) * 2 + B * nzp * 4 + weight_bytes + bias_bytes
    cost = pl.CostEstimate(flops=int(flops),
                           transcendentals=int(transcendentals),
                           bytes_accessed=int(bytes_accessed))

    args = (xb, packed["w1"], packed["b1"], packed["w2"], packed["b2"],
            packed["wfc"], packed["bfc"])

    if block_b is None or B <= block_b:
        # Single fused call — everything VMEM-resident, no grid.
        vmem = pl.BlockSpec(memory_space=pltpu.MemorySpace.VMEM)
        out = pl.pallas_call(
            encoder_kernel,
            out_shape=jax.ShapeDtypeStruct((B, nzp), jnp.float32),
            in_specs=[vmem] * len(args),
            out_specs=vmem,
            cost_estimate=cost,
        )(*args)
        return out[:, :n_z]

    # Batch-grid path: tile B, keep weights VMEM-resident (constant index_map).
    bp = _pad_to(B, block_b)
    xg = jnp.pad(xb, ((0, bp - B), (0, 0))) if bp != B else xb

    def const_spec(shape):
        return pl.BlockSpec(shape, lambda i: (0, 0))

    out = pl.pallas_call(
        encoder_kernel,
        out_shape=jax.ShapeDtypeStruct((bp, nzp), jnp.float32),
        grid_spec=pltpu.PrefetchScalarGridSpec(
            num_scalar_prefetch=0,
            grid=(bp // block_b,),
            in_specs=[
                pl.BlockSpec((block_b, D), lambda i: (i, 0)),
                const_spec(packed["w1"].shape),
                const_spec(packed["b1"].shape),
                const_spec(packed["w2"].shape),
                const_spec(packed["b2"].shape),
                const_spec(packed["wfc"].shape),
                const_spec(packed["bfc"].shape),
            ],
            out_specs=pl.BlockSpec((block_b, nzp), lambda i: (i, 0)),
        ),
        compiler_params=pltpu.CompilerParams(
            dimension_semantics=("parallel",)),
        cost_estimate=cost,
    )(xg, packed["w1"], packed["b1"], packed["w2"], packed["b2"],
      packed["wfc"], packed["bfc"])
    return out[:B, :n_z]


def encoder_ref(x, p):
    """Pure-JAX reference mirroring the kernel numerics (bf16 matmul inputs,
    f32 accumulation/elementwise) on the ORIGINAL unpadded parameters."""
    def gated(a, wh, bh, wg, bg):
        ab = a.astype(jnp.bfloat16)
        h = jnp.dot(ab, wh.astype(jnp.bfloat16),
                    preferred_element_type=jnp.float32) + bh
        g = jnp.dot(ab, wg.astype(jnp.bfloat16),
                    preferred_element_type=jnp.float32) + bg
        return h * jax.nn.sigmoid(g)

    a1 = gated(x, p["wh1"], p["bh1"], p["wg1"], p["bg1"])
    a2 = gated(a1, p["wh2"], p["bh2"], p["wg2"], p["bg2"])
    a2b = a2.astype(jnp.bfloat16)
    return jnp.dot(a2b, p["wfc"].astype(jnp.bfloat16),
                   preferred_element_type=jnp.float32) + p["bfc"]


if __name__ == "__main__":
    key = jax.random.PRNGKey(0)
    k_x, k_p, k_x2 = jax.random.split(key, 3)

    # args.input_size ~ (1, 16, 16) -> D = 256 ; args.z_size = 32 ; batch = 2
    B, input_size, n_z = 2, (1, 16, 16), 32
    D = int(math.prod(input_size))

    x_img = jax.random.normal(k_x, (B,) + input_size, jnp.float32)
    x = x_img.reshape(B, D)  # encoder consumes flattened input

    raw = make_params(k_p, D, HIDDEN, n_z)
    packed = pack_params(raw, D, n_z)

    # Small-batch, single fused call (latency-bound regime).
    z = encoder_forward(x, packed, n_z)
    jax.block_until_ready(z)
    z_ref = encoder_ref(x, raw)
    assert z.shape == (B, n_z)
    assert jnp.allclose(z, z_ref, atol=1e-3, rtol=1e-3), "mismatch vs reference (B=2)"

    # Larger batch exercises the batch-grid path: auto block_b -> 512-row
    # blocks, 2 grid steps (both v7x TCs busy, overhead amortized on v5e/v6e).
    B2 = 1024
    x2 = jax.random.normal(k_x2, (B2, D), jnp.float32)
    z2 = encoder_forward(x2, packed, n_z)
    jax.block_until_ready(z2)
    z2_ref = encoder_ref(x2, raw)
    assert z2.shape == (B2, n_z)
    assert jnp.allclose(z2, z2_ref, atol=1e-3, rtol=1e-3), "mismatch vs reference (B=1024)"

    print("KERNEL_OK")
</pallas_src>

<mosaic_0001>
module attributes {stable_mosaic.version = 11 : i64} {
  func.func @encoder_kernel(%arg0: memref<2x256xbf16, #tpu.memory_space<vmem>>, %arg1: memref<256x768xbf16, #tpu.memory_space<vmem>>, %arg2: memref<1x768xf32, #tpu.memory_space<vmem>>, %arg3: memref<384x768xbf16, #tpu.memory_space<vmem>>, %arg4: memref<1x768xf32, #tpu.memory_space<vmem>>, %arg5: memref<384x128xbf16, #tpu.memory_space<vmem>>, %arg6: memref<1x128xf32, #tpu.memory_space<vmem>>, %arg7: memref<2x128xf32, #tpu.memory_space<vmem>>) attributes {dimension_semantics = [], scalar_prefetch = 0 : i64, scratch_operands = 0 : i64, tpu.core_type = #tpu.core_type<tc>} {
    %c0 = arith.constant 0 : index
    %c0_0 = arith.constant 0 : index
    %0 = vector.load %arg0[%c0, %c0_0] : memref<2x256xbf16, #tpu.memory_space<vmem>>, vector<2x256xbf16>
    %c0_1 = arith.constant 0 : index
    %c0_2 = arith.constant 0 : index
    %1 = vector.load %arg1[%c0_1, %c0_2] : memref<256x768xbf16, #tpu.memory_space<vmem>>, vector<256x768xbf16>
    %cst = arith.constant dense<0.000000e+00> : vector<2x768xf32>
    %2 = tpu.matmul %0, %1, %cst {dimension_numbers = #tpu.dot_dimension_numbers<[1], [0], [0], [1], [0, 0, 1, 1], [], []>} : vector<2x256xbf16>, vector<256x768xbf16>, vector<2x768xf32> -> vector<2x768xf32>
    %c0_3 = arith.constant 0 : index
    %c0_4 = arith.constant 0 : index
    %3 = vector.load %arg2[%c0_3, %c0_4] : memref<1x768xf32, #tpu.memory_space<vmem>>, vector<1x768xf32>
    %4 = vector.broadcast %3 : vector<1x768xf32> to vector<2x768xf32>
    %5 = arith.addf %2, %4 : vector<2x768xf32>
    %6 = vector.extract_strided_slice %5 {offsets = [0, 0], sizes = [2, 384], strides = [1, 1]} : vector<2x768xf32> to vector<2x384xf32>
    %7 = vector.extract_strided_slice %5 {offsets = [0, 384], sizes = [2, 384], strides = [1, 1]} : vector<2x768xf32> to vector<2x384xf32>
    %8 = arith.negf %7 : vector<2x384xf32>
    %9 = math.exp %8 : vector<2x384xf32>
    %cst_5 = arith.constant 1.000000e+00 : f32
    %10 = vector.broadcast %cst_5 : f32 to vector<2x384xf32>
    %11 = arith.addf %10, %9 : vector<2x384xf32>
    %12 = arith.divf %10, %11 : vector<2x384xf32>
    %13 = arith.mulf %6, %12 : vector<2x384xf32>
    %14 = arith.truncf %13 : vector<2x384xf32> to vector<2x384xbf16>
    %c0_6 = arith.constant 0 : index
    %c0_7 = arith.constant 0 : index
    %15 = vector.load %arg3[%c0_6, %c0_7] : memref<384x768xbf16, #tpu.memory_space<vmem>>, vector<384x768xbf16>
    %cst_8 = arith.constant dense<0.000000e+00> : vector<2x768xf32>
    %16 = tpu.matmul %14, %15, %cst_8 {dimension_numbers = #tpu.dot_dimension_numbers<[1], [0], [0], [1], [0, 0, 1, 1], [], []>} : vector<2x384xbf16>, vector<384x768xbf16>, vector<2x768xf32> -> vector<2x768xf32>
    %c0_9 = arith.constant 0 : index
    %c0_10 = arith.constant 0 : index
    %17 = vector.load %arg4[%c0_9, %c0_10] : memref<1x768xf32, #tpu.memory_space<vmem>>, vector<1x768xf32>
    %18 = vector.broadcast %17 : vector<1x768xf32> to vector<2x768xf32>
    %19 = arith.addf %16, %18 : vector<2x768xf32>
    %20 = vector.extract_strided_slice %19 {offsets = [0, 0], sizes = [2, 384], strides = [1, 1]} : vector<2x768xf32> to vector<2x384xf32>
    %21 = vector.extract_strided_slice %19 {offsets = [0, 384], sizes = [2, 384], strides = [1, 1]} : vector<2x768xf32> to vector<2x384xf32>
    %22 = arith.negf %21 : vector<2x384xf32>
    %23 = math.exp %22 : vector<2x384xf32>
    %cst_11 = arith.constant 1.000000e+00 : f32
    %24 = vector.broadcast %cst_11 : f32 to vector<2x384xf32>
    %25 = arith.addf %24, %23 : vector<2x384xf32>
    %26 = arith.divf %24, %25 : vector<2x384xf32>
    %27 = arith.mulf %20, %26 : vector<2x384xf32>
    %28 = arith.truncf %27 : vector<2x384xf32> to vector<2x384xbf16>
    %c0_12 = arith.constant 0 : index
    %c0_13 = arith.constant 0 : index
    %29 = vector.load %arg5[%c0_12, %c0_13] : memref<384x128xbf16, #tpu.memory_space<vmem>>, vector<384x128xbf16>
    %cst_14 = arith.constant dense<0.000000e+00> : vector<2x128xf32>
    %30 = tpu.matmul %28, %29, %cst_14 {dimension_numbers = #tpu.dot_dimension_numbers<[1], [0], [0], [1], [0, 0, 1, 1], [], []>} : vector<2x384xbf16>, vector<384x128xbf16>, vector<2x128xf32> -> vector<2x128xf32>
    %c0_15 = arith.constant 0 : index
    %c0_16 = arith.constant 0 : index
    %31 = vector.load %arg6[%c0_15, %c0_16] : memref<1x128xf32, #tpu.memory_space<vmem>>, vector<1x128xf32>
    %32 = vector.broadcast %31 : vector<1x128xf32> to vector<2x128xf32>
    %33 = arith.addf %30, %32 : vector<2x128xf32>
    %c0_17 = arith.constant 0 : index
    %c0_18 = arith.constant 0 : index
    %34 = vector.load %arg7[%c0_17, %c0_18] : memref<2x128xf32, #tpu.memory_space<vmem>>, vector<2x128xf32>
    tpu.vector_store %arg7[%c0_17, %c0_18], %33 {strides = array<i32>} : memref<2x128xf32, #tpu.memory_space<vmem>>, vector<2x128xf32>,
    return
  }
}

</mosaic_0001>

<bundles_post_ra>
// kernel: tpu_custom_call.1
= control target key start
LH: loop header
LB: loop body
LE: loop exit
PB: predicated region body
PF: predicated region fallthrough
CT: control target
= control target key end

     0   :  { %12 = vsyncpa [#allocation3], 0  ;;  %s3360_s0 = inlined_call_operand.hbm [shape: bf16[2,256], index: 0, kind: input, shape index: {}]   ;;  %s3361_s1 = inlined_call_operand.hbm [shape: bf16[256,768], index: 1, kind: input, shape index: {}]   ;;  %s3362_s2 = inlined_call_operand.hbm [shape: f32[1,768], index: 2, kind: input, shape index: {}]   ;;  %s3363_s3 = inlined_call_operand.hbm [shape: bf16[384,768], index: 3, kind: input, shape index: {}]   ;;  %s3364_s4 = inlined_call_operand.vmem [shape: f32[1,768], index: 4, kind: input, shape index: {}]   ;;  %s3365_s5 = inlined_call_operand.hbm [shape: bf16[384,128], index: 5, kind: input, shape index: {}]   ;;  %s3366_s6 = inlined_call_operand.vmem [shape: f32[1,128], index: 6, kind: input, shape index: {}]   ;;  %s3367_s7 = inlined_call_operand.hbm [shape: f32[2,128], index: 7, kind: output, shape index: {}]  }
   0x1   :  { %13 = vsyncpa [#allocation6], 0 }
   0x2   :  { %14 = vsyncpa [#allocation9], 0 }
   0x3   :  { %15 = vsyncpa [#allocation4], 0  ;;  %s3209_s24 = smov [#allocation5]  }
   0x4   :  { %s31_s25 = sshll.u32 %s3209_s24, 4  ;;  %s32_s25 = int_to_ptr.vmem [resolvable:$true] %s31_s25 }
   0x5   :  { %s3089_s26 = scalar_lea.vmem %s32_s25, 12288  ;;  %p3094_p1 = scmp.lt.s32.totalorder %s32_s25, %s32_s25 }
   0x6   :  { %p3090_p0 = scmp.ne.s32.totalorder %s32_s25, %s3089_s26  ;;  %p3095_p2 = scmp.lt.s32.totalorder %s3089_s26, %s3089_s26 }
   0x8   :  { %p3096_p3 = por %p3095_p2, %p3094_p1 }
   0xa   :  { %p3097_p4 = pnand %p3096_p3, %p3090_p0 }
   0xc   :  { %3100 = shalt.err (!%p3097_p4)
}
   0xd   :  { %s3210_s27 = smov 384   ;;  %s3211_s28 = smov 24  }
   0xe   :  { %37 = dma.hbm_to_vmem [thread:$0]  %s3361_s1, 12288, %s32_s25, [#allocation6], %s3210_s27, %s3210_s27, %s3211_s28  }
   0xf   :  { %s3212_s8 = smov [#allocation8]   ;;  %s3213_s10 = smov [#allocation2]  }
  0x10   :  { %s53_s9 = sshll.u32 %s3212_s8, 4  ;;  %s22_s11 = sshll.u32 %s3213_s10, 4  ;;  %s54_s9 = int_to_ptr.vmem [resolvable:$true] %s53_s9  ;;  %s23_s11 = int_to_ptr.vmem [resolvable:$true] %s22_s11 }
  0x11   :  { %s3109_s12 = scalar_lea.vmem %s54_s9, 18432  ;;  %p3114_p6 = scmp.lt.s32.totalorder %s54_s9, %s54_s9 }
  0x12   :  { %p3110_p5 = scmp.ne.s32.totalorder %s54_s9, %s3109_s12  ;;  %p3115_p7 = scmp.lt.s32.totalorder %s3109_s12, %s3109_s12 }
  0x14   :  { %p3116_p8 = por %p3115_p7, %p3114_p6 }
  0x16   :  { %p3117_p9 = pnand %p3116_p8, %p3110_p5 }
  0x18   :  { %3120 = shalt.err (!%p3117_p9)
}
  0x19   :  { %59 = dma.hbm_to_vmem [thread:$0]  %s3363_s3, 18432, %s54_s9, [#allocation9], %s3210_s27, %s3210_s27, %s3211_s28  }
  0x1a   :  { %s3129_s15 = scalar_lea.vmem %s23_s11, 32  ;;  %p3134_p11 = scmp.lt.s32.totalorder %s23_s11, %s23_s11 }
  0x1b   :  { %p3130_p10 = scmp.ne.s32.totalorder %s23_s11, %s3129_s15  ;;  %p3135_p12 = scmp.lt.s32.totalorder %s3129_s15, %s3129_s15 }
  0x1d   :  { %p3136_p13 = por %p3135_p12, %p3134_p11 }
  0x1f   :  { %p3137_p0 = pnand %p3136_p13, %p3130_p10 }
  0x21   :  { %3140 = shalt.err (!%p3137_p0)
}
  0x22   :  { %25 = dma.hbm_to_vmem [thread:$0]  %s3360_s0, 32, %s23_s11, [#allocation3]  }
  0x23   :  { %s3214_s17 = smov [#allocation7]   ;;  %s3215_s19 = smov [#allocation10]  }
  0x24   :  { %s44_s18 = sshll.u32 %s3214_s17, 4  ;;  %s67_s20 = sshll.u32 %s3215_s19, 4  ;;  %s45_s18 = int_to_ptr.vmem [resolvable:$true] %s44_s18  ;;  %s68_s20 = int_to_ptr.vmem [resolvable:$true] %s67_s20 }
  0x25   :  { %s3149_s21 = scalar_lea.vmem %s45_s18, 96  ;;  %p3154_p2 = scmp.lt.s32.totalorder %s45_s18, %s45_s18 }
  0x26   :  { %p3150_p1 = scmp.ne.s32.totalorder %s45_s18, %s3149_s21  ;;  %p3155_p3 = scmp.lt.s32.totalorder %s3149_s21, %s3149_s21 }
  0x28   :  { %p3156_p4 = por %p3155_p3, %p3154_p2 }
  0x2a   :  { %p3157_p5 = pnand %p3156_p4, %p3150_p1 }
  0x2c   :  { %3160 = shalt.err (!%p3157_p5)
}
  0x2d   :  { %47 = dma.hbm_to_vmem [thread:$0]  %s3362_s2, 96, %s45_s18, [#allocation6]  }
  0x2e   :  { %s3169_s23 = scalar_lea.vmem %s68_s20, 3072  ;;  %p3174_p7 = scmp.lt.s32.totalorder %s68_s20, %s68_s20 }
  0x2f   :  { %p3170_p6 = scmp.ne.s32.totalorder %s68_s20, %s3169_s23  ;;  %p3175_p8 = scmp.lt.s32.totalorder %s3169_s23, %s3169_s23 }
  0x31   :  { %p3176_p9 = por %p3175_p8, %p3174_p7 }
  0x33   :  { %p3177_p10 = pnand %p3176_p9, %p3170_p6 }
  0x35   :  { %3180 = shalt.err (!%p3177_p10)
}
  0x36   :  { %s3216_s0 = smov 64   ;;  %s3217_s24 = smov 4  }
  0x37   :  { %73 = dma.hbm_to_vmem [thread:$0]  %s3365_s5, 3072, %s68_s20, [#allocation9], %s3216_s0, %s3216_s0, %s3217_s24  }
  0x38   :  { %3201 = dma.done.wait [#allocation3], 32  }
  0x39   :  { %3202 = vsyncadd [#allocation3], 4294967264 }
  0x3a   :  { %3203 = dma.done.wait [#allocation6], 12384  }
  0x3b   :  { %3204 = vsyncadd [#allocation6], 4294954912 }
  0x3c   :  { %3205 = dma.done.wait [#allocation9], 21504  }
  0x3d   :  { %3206 = vsyncadd [#allocation9], 4294945792  ;;  %v2673_v0 = vld [vmem:[#allocation5 + $0x154] ss:$24 sps:$4 sm:$0xff]   ;;  %v2677_v2 = vld [vmem:[#allocation5 + $0x150] ss:$24 sps:$4 sm:$0xff]   ;;  %v191_v38 = vlaneseq }
  0x3e   :  { %v2675_v1 = vld [vmem:[#allocation5 + $0x15c] ss:$24 sps:$4 sm:$0xff]   ;;  %726 = vmatprep.subr.bf16.mxu0 %v2673_v0  ;;  %v2678_v3 = vld [vmem:[#allocation5 + $0x158] ss:$24 sps:$4 sm:$0xff]   ;;  %v2681_v5 = vld [vmem:[#allocation5 + $0x12c] ss:$24 sps:$4 sm:$0xff]  }
  0x3f   :  { %767 = vmatprep.subr.bf16.mxu1 %v2675_v1  ;;  %v2679_v4 = vld [vmem:[#allocation5 + $0x124] ss:$24 sps:$4 sm:$0xff]   ;;  %727 = vmatpush1.bf16.msra.mxu0 %v2677_v2  ;;  %v2683_v6 = vld [vmem:[#allocation5 + $0x120] ss:$24 sps:$4 sm:$0xff]   ;;  %v2685_v8 = vld [vmem:[#allocation5 + $0xf4] ss:$24 sps:$4 sm:$0xff]  }
  0x40   :  { %768 = vmatpush1.bf16.msra.mxu1 %v2678_v3  ;;  %728 = vmatprep.subr.bf16.mxu0 %v2679_v4  ;;  %v2684_v7 = vld [vmem:[#allocation5 + $0x128] ss:$24 sps:$4 sm:$0xff]   ;;  %v2687_v9 = vld [vmem:[#allocation5 + $0xfc] ss:$24 sps:$4 sm:$0xff]   ;;  %v2690_v11 = vld [vmem:[#allocation5 + $0xf8] ss:$24 sps:$4 sm:$0xff]  }
  0x41   :  { %769 = vmatprep.subr.bf16.mxu1 %v2681_v5  ;;  %v2689_v10 = vld [vmem:[#allocation5 + $0xf0] ss:$24 sps:$4 sm:$0xff]   ;;  %v2691_v12 = vld [vmem:[#allocation5 + $0xc4] ss:$24 sps:$4 sm:$0xff]   ;;  %v2695_v14 = vld [vmem:[#allocation5 + $0xc0] ss:$24 sps:$4 sm:$0xff]  }
  0x42   :  { %v2693_v13 = vld [vmem:[#allocation5 + $0xcc] ss:$24 sps:$4 sm:$0xff]   ;;  %v2696_v15 = vld [vmem:[#allocation5 + $0xc8] ss:$24 sps:$4 sm:$0xff]   ;;  %v2699_v17 = vld [vmem:[#allocation5 + $0x9c] ss:$24 sps:$4 sm:$0xff]  }
  0x43   :  { %729 = vmatpush1.bf16.msra.mxu0 %v2683_v6  ;;  %v2697_v16 = vld [vmem:[#allocation5 + $0x94] ss:$24 sps:$4 sm:$0xff]   ;;  %v2701_v18 = vld [vmem:[#allocation5 + $0x90] ss:$24 sps:$4 sm:$0xff]   ;;  %v2703_v20 = vld [vmem:[#allocation5 + $0x64] ss:$24 sps:$4 sm:$0xff]  }
  0x44   :  { %770 = vmatpush1.bf16.msra.mxu1 %v2684_v7  ;;  %730 = vmatprep.subr.bf16.mxu0 %v2685_v8  ;;  %v2702_v19 = vld [vmem:[#allocation5 + $0x98] ss:$24 sps:$4 sm:$0xff]   ;;  %v2705_v21 = vld [vmem:[#allocation5 + $0x6c] ss:$24 sps:$4 sm:$0xff]   ;;  %v2708_v23 = vld [vmem:[#allocation5 + $0x68] ss:$24 sps:$4 sm:$0xff]  }
  0x45   :  { %771 = vmatprep.subr.bf16.mxu1 %v2687_v9  ;;  %v2707_v22 = vld [vmem:[#allocation5 + $0x60] ss:$24 sps:$4 sm:$0xff]   ;;  %v2709_v24 = vld [vmem:[#allocation5 + $0x34] ss:$24 sps:$4 sm:$0xff]   ;;  %v2713_v26 = vld [vmem:[#allocation5 + $0x30] ss:$24 sps:$4 sm:$0xff]  }
  0x46   :  { %v2711_v25 = vld [vmem:[#allocation5 + $0x3c] ss:$24 sps:$4 sm:$0xff]   ;;  %v2714_v27 = vld [vmem:[#allocation5 + $0x38] ss:$24 sps:$4 sm:$0xff]   ;;  %v2717_v29 = vld [vmem:[#allocation5 + $0xc] ss:$24 sps:$4 sm:$0xff]  }
  0x47   :  { %731 = vmatpush1.bf16.msra.mxu0 %v2689_v10  ;;  %v2715_v28 = vld [vmem:[#allocation5 + $0x4] ss:$24 sps:$4 sm:$0xff]   ;;  %v2719_v30 = vld [vmem:[#allocation5] ss:$24 sps:$4 sm:$0xff]   ;;  %v2721_v32 = vld [vmem:[#allocation5 + $0x2d4] ss:$24 sps:$4 sm:$0xff]  }
  0x48   :  { %772 = vmatpush1.bf16.msra.mxu1 %v2690_v11  ;;  %732 = vmatprep.subr.bf16.mxu0 %v2691_v12  ;;  %v2720_v31 = vld [vmem:[#allocation5 + $0x8] ss:$24 sps:$4 sm:$0xff]   ;;  %v2723_v33 = vld [vmem:[#allocation5 + $0x2dc] ss:$24 sps:$4 sm:$0xff]   ;;  %v2726_v35 = vld [vmem:[#allocation5 + $0x2d8] ss:$24 sps:$4 sm:$0xff]  }
  0x49   :  { %773 = vmatprep.subr.bf16.mxu1 %v2693_v13  ;;  %v2725_v34 = vld [vmem:[#allocation5 + $0x2d0] ss:$24 sps:$4 sm:$0xff]   ;;  %v2727_v36 = vld [vmem:[#allocation5 + $0x2a4] ss:$24 sps:$4 sm:$0xff]   ;;  %v3218_v39 = vmov 1966171168  }
  0x4a   :  { %v2729_v37 = vld [vmem:[#allocation5 + $0x2ac] ss:$24 sps:$4 sm:$0xff]   ;;  %v231_v40 = vunpack.c.l.s4 %v3218_v39  ;;  %v2731_v41 = vld [vmem:[#allocation5 + $0x2a0] ss:$24 sps:$4 sm:$0xff]   ;;  %v2735_v44 = vld [vmem:[#allocation5 + $0x27c] ss:$24 sps:$4 sm:$0xff]  }
  0x4b   :  { %733 = vmatpush1.bf16.msra.mxu0 %v2695_v14  ;;  %v2732_v42 = vld [vmem:[#allocation5 + $0x2a8] ss:$24 sps:$4 sm:$0xff]   ;;  %v2733_v43 = vld [vmem:[#allocation5 + $0x274] ss:$24 sps:$4 sm:$0xff]   ;;  %v3278_v45 = vshrl.u32 %v191_v38, 7  ;;  %vm3221_vm0 = vmmov 0  }
  0x4c   :  { %774 = vmatpush1.bf16.msra.mxu1 %v2696_v15  ;;  %734 = vmatprep.subr.bf16.mxu0 %v2697_v16  ;;  %v232_v46 = vunpack.c.0.s8 %v231_v40  ;;  %v2737_v47 = vld [vmem:[#allocation5 + $0x270] ss:$24 sps:$4 sm:$0xff]   ;;  %v2739_v49 = vld [vmem:[#allocation5 + $0x244] ss:$24 sps:$4 sm:$0xff]   ;;  %v2743_v53 = vld [vmem:[#allocation5 + $0x240] ss:$24 sps:$4 sm:$0xff]  }
  0x4d   :  { %775 = vmatprep.subr.bf16.mxu1 %v2699_v17  ;;  %v2738_v48 = vld [vmem:[#allocation5 + $0x278] ss:$24 sps:$4 sm:$0xff]   ;;  %v2741_v50 = vld [vmem:[#allocation5 + $0x24c] ss:$24 sps:$4 sm:$0xff]   ;;  %v2744_v54 = vld [vmem:[#allocation5 + $0x248] ss:$24 sps:$4 sm:$0xff]  }
  0x4e   :  { %v235_v51 = vsub.s32 %v232_v46, %v3278_v45  ;;  %v2336_v52 = vld.sshfl [vmem:[#allocation2] sm:$0x11 pattern:$0x75316420]  ;;  %v2745_v56 = vld [vmem:[#allocation5 + $0x214] ss:$24 sps:$4 sm:$0xff]  }
  0x4f   :  { %735 = vmatpush1.bf16.msra.mxu0 %v2701_v18  ;;  %v229_v55 = vcombine.high %v2336_v52, %v2336_v52  ;;  %v2747_v57 = vld [vmem:[#allocation5 + $0x21c] ss:$24 sps:$4 sm:$0xff]   ;;  %v2749_v59 = vld [vmem:[#allocation5 + $0x210] ss:$24 sps:$4 sm:$0xff]   ;;  %v2753_v62 = vld [vmem:[#allocation5 + $0x1ec] ss:$24 sps:$4 sm:$0xff]  }
  0x50   :  { %776 = vmatpush1.bf16.msra.mxu1 %v2702_v19  ;;  %736 = vmatprep.subr.bf16.mxu0 %v2703_v20  ;;  %v2750_v60 = vld [vmem:[#allocation5 + $0x218] ss:$24 sps:$4 sm:$0xff]   ;;  %v2751_v61 = vld [vmem:[#allocation5 + $0x1e4] ss:$24 sps:$4 sm:$0xff]   ;;  %v2756_v0 = vld [vmem:[#allocation5 + $0x1e8] ss:$24 sps:$4 sm:$0xff]   ;;  %v3281_v10 = vrot.slane %v2336_v52, %v235_v51 }
  0x51   :  { %777 = vmatprep.subr.bf16.mxu1 %v2705_v21  ;;  %v243_v58 = vrot.slane %v229_v55, %v235_v51  ;;  %v2755_v63 = vld [vmem:[#allocation5 + $0x1e0] ss:$24 sps:$4 sm:$0xff]   ;;  %v2757_v1 = vld [vmem:[#allocation5 + $0x1b4] ss:$24 sps:$4 sm:$0xff]   ;;  %v2761_v3 = vld [vmem:[#allocation5 + $0x1b0] ss:$24 sps:$4 sm:$0xff]  }
  0x52   :  { %v2759_v2 = vld [vmem:[#allocation5 + $0x1bc] ss:$24 sps:$4 sm:$0xff]   ;;  %v2762_v4 = vld [vmem:[#allocation5 + $0x1b8] ss:$24 sps:$4 sm:$0xff]   ;;  %v2765_v6 = vld [vmem:[#allocation5 + $0x18c] ss:$24 sps:$4 sm:$0xff]  }
  0x53   :  { %737 = vmatpush1.bf16.msra.mxu0 %v2707_v22  ;;  %758 = vmatprep.mubr.bf16.mxu0 %v243_v58  ;;  %v2763_v5 = vld [vmem:[#allocation5 + $0x184] ss:$24 sps:$4 sm:$0xff]   ;;  %v2767_v7 = vld [vmem:[#allocation5 + $0x180] ss:$24 sps:$4 sm:$0xff]   ;;  %v2774_v12 = vld [vmem:[#allocation5 + $0x134] ss:$24 sps:$4 sm:$0xff]  }
  0x54   :  { %778 = vmatpush1.bf16.msra.mxu1 %v2708_v23  ;;  %738 = vmatprep.subr.bf16.mxu0 %v2709_v24  ;;  %v2768_v8 = vld [vmem:[#allocation5 + $0x188] ss:$24 sps:$4 sm:$0xff]   ;;  %v2771_v9 = vld [vmem:[#allocation5 + $0x164] ss:$24 sps:$4 sm:$0xff]   ;;  %v2780_v16 = vld [vmem:[#allocation5 + $0xd4] ss:$24 sps:$4 sm:$0xff]  }
  0x55   :  { %779 = vmatprep.subr.bf16.mxu1 %v2711_v25  ;;  %799 = vmatprep.mubr.bf16.mxu1 %v243_v58  ;;  %v2769_v11 = vld [vmem:[#allocation5 + $0x160] ss:$24 sps:$4 sm:$0xff]   ;;  %v2772_v13 = vld [vmem:[#allocation5 + $0x130] ss:$24 sps:$4 sm:$0xff]   ;;  %v2777_v14 = vld [vmem:[#allocation5 + $0x104] ss:$24 sps:$4 sm:$0xff]  }
  0x56   :  { %v2775_v15 = vld [vmem:[#allocation5 + $0x100] ss:$24 sps:$4 sm:$0xff]   ;;  %v2778_v17 = vld [vmem:[#allocation5 + $0xd0] ss:$24 sps:$4 sm:$0xff]   ;;  %v2783_v18 = vld [vmem:[#allocation5 + $0xa4] ss:$24 sps:$4 sm:$0xff]  }
  0x57   :  { %739 = vmatpush1.bf16.msra.mxu0 %v2713_v26  ;;  %v2781_v19 = vld [vmem:[#allocation5 + $0xa0] ss:$24 sps:$4 sm:$0xff]   ;;  %v2786_v20 = vld [vmem:[#allocation5 + $0x74] ss:$24 sps:$4 sm:$0xff]   ;;  %v2784_v21 = vld [vmem:[#allocation5 + $0x70] ss:$24 sps:$4 sm:$0xff]  }
  0x58   :  { %780 = vmatpush1.bf16.msra.mxu1 %v2714_v27  ;;  %740 = vmatprep.subr.bf16.mxu0 %v2715_v28  ;;  %v2789_v22 = vld [vmem:[#allocation5 + $0x44] ss:$24 sps:$4 sm:$0xff]   ;;  %v2787_v23 = vld [vmem:[#allocation5 + $0x40] ss:$24 sps:$4 sm:$0xff]   ;;  %v2792_v24 = vld [vmem:[#allocation5 + $0x14] ss:$24 sps:$4 sm:$0xff]  }
  0x59   :  { %781 = vmatprep.subr.bf16.mxu1 %v2717_v29  ;;  %v2790_v25 = vld [vmem:[#allocation5 + $0x10] ss:$24 sps:$4 sm:$0xff]   ;;  %v2795_v26 = vld [vmem:[#allocation5 + $0x2e4] ss:$24 sps:$4 sm:$0xff]   ;;  %v2793_v27 = vld [vmem:[#allocation5 + $0x2e0] ss:$24 sps:$4 sm:$0xff]  }
  0x5a   :  { %v2798_v28 = vld [vmem:[#allocation5 + $0x2b4] ss:$24 sps:$4 sm:$0xff]   ;;  %v2796_v29 = vld [vmem:[#allocation5 + $0x2b0] ss:$24 sps:$4 sm:$0xff]   ;;  %v2813_v38 = vld [vmem:[#allocation5 + $0x1c4] ss:$24 sps:$4 sm:$0xff]  }
  0x5b   :  { %741 = vmatpush1.bf16.msra.mxu0 %v2719_v30  ;;  %v2801_v30 = vld [vmem:[#allocation5 + $0x284] ss:$24 sps:$4 sm:$0xff]   ;;  %v2811_v39 = vld [vmem:[#allocation5 + $0x1c0] ss:$24 sps:$4 sm:$0xff]   ;;  %v2816_v40 = vld [vmem:[#allocation5 + $0x194] ss:$24 sps:$4 sm:$0xff]  }
  0x5c   :  { %782 = vmatpush1.bf16.msra.mxu1 %v2720_v31  ;;  %742 = vmatprep.subr.bf16.mxu0 %v2721_v32  ;;  %v2799_v31 = vld [vmem:[#allocation5 + $0x280] ss:$24 sps:$4 sm:$0xff]   ;;  %v2804_v32 = vld [vmem:[#allocation5 + $0x254] ss:$24 sps:$4 sm:$0xff]   ;;  %s3222_s28 = smov [#allocation11]  }
  0x5d   :  { %783 = vmatprep.subr.bf16.mxu1 %v2723_v33  ;;  %v2802_v33 = vld [vmem:[#allocation5 + $0x250] ss:$24 sps:$4 sm:$0xff]   ;;  %s2325_s29 = sshll.u32 %s3222_s28, 4  ;;  %s2326_s29 = int_to_ptr.vmem [resolvable:$true] %s2325_s29 }
  0x5e   :  { %v2820_v46 = vld [vmem:[#allocation8 + $0x120] ss:$24 sps:$4 sm:$0xff]   ;;  %v2831_v51 = vld [vmem:[#allocation8 + $0x94] ss:$24 sps:$4 sm:$0xff]   ;;  %v2829_v52 = vld [vmem:[#allocation8 + $0x90] ss:$24 sps:$4 sm:$0xff]   ;;  %p3186_p12 = scmp.lt.s32.totalorder %s2326_s29, %s2326_s29 }
  0x5f   :  { %743 = vmatpush2.bf16.msra.mxu0 %v2725_v34  ;;  %v2807_v34 = vld [vmem:[#allocation5 + $0x224] ss:$24 sps:$4 sm:$0xff]   ;;  %s3181_s30 = scalar_lea.vmem %s2326_s29, 32 }
  0x60   :  { %784 = vmatpush2.bf16.msra.mxu1 %v2726_v35  ;;  %744 = vmatprep.subr.bf16.mxu0 %v2727_v36  ;;  %v2805_v35 = vld [vmem:[#allocation5 + $0x220] ss:$24 sps:$4 sm:$0xff]   ;;  %v2810_v36 = vld [vmem:[#allocation5 + $0x1f4] ss:$24 sps:$4 sm:$0xff]   ;;  %p3182_p11 = scmp.ne.s32.totalorder %s2326_s29, %s3181_s30  ;;  %p3187_p13 = scmp.lt.s32.totalorder %s3181_s30, %s3181_s30 }
  0x61   :  { %785 = vmatprep.subr.bf16.mxu1 %v2729_v37  ;;  %v2808_v37 = vld [vmem:[#allocation5 + $0x1f0] ss:$24 sps:$4 sm:$0xff]  }
  0x62   :  { %v2837_v55 = vld [vmem:[#allocation8 + $0x34] ss:$24 sps:$4 sm:$0xff]   ;;  %p3188_p0 = por %p3187_p13, %p3186_p12 }
  0x63   :  { %745 = vmatpush2.bf16.msra.mxu0 %v2731_v41  ;;  %v2814_v41 = vld [vmem:[#allocation5 + $0x190] ss:$24 sps:$4 sm:$0xff]  }
  0x64   :  { %786 = vmatpush2.bf16.msra.mxu1 %v2732_v42  ;;  %746 = vmatprep.subr.bf16.mxu0 %v2733_v43  ;;  %v2817_v42 = vld [vmem:[#allocation8 + $0x150] ss:$24 sps:$4 sm:$0xff]   ;;  %v2819_v43 = vld [vmem:[#allocation8 + $0x154] ss:$24 sps:$4 sm:$0xff]   ;;  %p3189_p1 = pnand %p3188_p0, %p3182_p11 }
  0x65   :  { %787 = vmatprep.subr.bf16.mxu1 %v2735_v44  ;;  %v2822_v44 = vld [vmem:[#allocation8 + $0x124] ss:$24 sps:$4 sm:$0xff]  }
  0x67   :  { %747 = vmatpush2.bf16.msra.mxu0 %v2737_v47  ;;  %v2825_v47 = vld [vmem:[#allocation8 + $0xf4] ss:$24 sps:$4 sm:$0xff]  }
  0x68   :  { %788 = vmatpush2.bf16.msra.mxu1 %v2738_v48  ;;  %748 = vmatprep.subr.bf16.mxu0 %v2739_v49  ;;  %v2823_v48 = vld [vmem:[#allocation8 + $0xf0] ss:$24 sps:$4 sm:$0xff]   ;;  %v2828_v49 = vld [vmem:[#allocation8 + $0xc4] ss:$24 sps:$4 sm:$0xff]  }
  0x69   :  { %789 = vmatprep.subr.bf16.mxu1 %v2741_v50  ;;  %v2826_v50 = vld [vmem:[#allocation8 + $0xc0] ss:$24 sps:$4 sm:$0xff]  }
  0x6b   :  { %749 = vmatpush2.bf16.msra.mxu0 %v2743_v53  ;;  %v2834_v53 = vld [vmem:[#allocation8 + $0x64] ss:$24 sps:$4 sm:$0xff]  }
  0x6c   :  { %790 = vmatpush2.bf16.msra.mxu1 %v2744_v54  ;;  %750 = vmatprep.subr.bf16.mxu0 %v2745_v56  ;;  %v2832_v54 = vld [vmem:[#allocation8 + $0x60] ss:$24 sps:$4 sm:$0xff]   ;;  %v2835_v56 = vld [vmem:[#allocation8 + $0x30] ss:$24 sps:$4 sm:$0xff]  }
  0x6d   :  { %791 = vmatprep.subr.bf16.mxu1 %v2747_v57  ;;  %v2840_v57 = vld [vmem:[#allocation8 + $0x4] ss:$24 sps:$4 sm:$0xff]  }
  0x6f   :  { %751 = vmatpush2.bf16.msra.mxu0 %v2749_v59  ;;  %v2843_v59 = vld [vmem:[#allocation8 + $0x2d4] ss:$24 sps:$4 sm:$0xff]  }
  0x70   :  { %792 = vmatpush2.bf16.msra.mxu1 %v2750_v60  ;;  %752 = vmatprep.subr.bf16.mxu0 %v2751_v61  ;;  %v2841_v60 = vld [vmem:[#allocation8 + $0x2d0] ss:$24 sps:$4 sm:$0xff]   ;;  %v2846_v61 = vld [vmem:[#allocation8 + $0x454] ss:$24 sps:$4 sm:$0xff]  }
  0x71   :  { %793 = vmatprep.subr.bf16.mxu1 %v2753_v62  ;;  %v2844_v62 = vld [vmem:[#allocation8 + $0x450] ss:$24 sps:$4 sm:$0xff]  }
  0x73   :  { %753 = vmatpush2.bf16.msra.mxu0 %v2755_v63  ;;  %v2849_v63 = vld [vmem:[#allocation8 + $0x2a4] ss:$24 sps:$4 sm:$0xff]  }
  0x74   :  { %794 = vmatpush2.bf16.msra.mxu1 %v2756_v0  ;;  %754 = vmatprep.subr.bf16.mxu0 %v2757_v1  ;;  %v2847_v0 = vld [vmem:[#allocation8 + $0x2a0] ss:$24 sps:$4 sm:$0xff]   ;;  %v2852_v1 = vld [vmem:[#allocation8 + $0x424] ss:$24 sps:$4 sm:$0xff]  }
  0x75   :  { %795 = vmatprep.subr.bf16.mxu1 %v2759_v2  ;;  %v2850_v2 = vld [vmem:[#allocation8 + $0x420] ss:$24 sps:$4 sm:$0xff]  }
  0x77   :  { %755 = vmatpush2.bf16.msra.mxu0 %v2761_v3  ;;  %v2855_v3 = vld [vmem:[#allocation8 + $0x274] ss:$24 sps:$4 sm:$0xff]  }
  0x78   :  { %796 = vmatpush2.bf16.msra.mxu1 %v2762_v4  ;;  %756 = vmatprep.subr.bf16.mxu0 %v2763_v5  ;;  %v2853_v4 = vld [vmem:[#allocation8 + $0x270] ss:$24 sps:$4 sm:$0xff]   ;;  %v2858_v5 = vld [vmem:[#allocation8 + $0x3f4] ss:$24 sps:$4 sm:$0xff]  }
  0x79   :  { %797 = vmatprep.subr.bf16.mxu1 %v2765_v6  ;;  %v2856_v6 = vld [vmem:[#allocation8 + $0x3f0] ss:$24 sps:$4 sm:$0xff]  }
  0x7b   :  { %757 = vmatpush2.bf16.msra.mxu0 %v2767_v7  ;;  %v2861_v7 = vld [vmem:[#allocation8 + $0x244] ss:$24 sps:$4 sm:$0xff]  }
  0x7c   :  { %798 = vmatpush2.bf16.msra.mxu1 %v2768_v8  ;;  %808 = vmatprep.subr.bf16.mxu0 %v2771_v9  ;;  %v2859_v8 = vld [vmem:[#allocation8 + $0x240] ss:$24 sps:$4 sm:$0xff]   ;;  %v2864_v9 = vld [vmem:[#allocation8 + $0x3c4] ss:$24 sps:$4 sm:$0xff]  }
  0x7d   :  { %1769 = vmatprep.subr.bf16.mxu1 %v2819_v43 }
  0x7e   :  { %759 = vmatmul.mubr.bf16.vlgmr.msra.gmra.mxu0 %v3281_v10 }
  0x7f   :  { %800 = vmatmul.mubr.bf16.vlgmr.msra.gmra.mxu1 %v3281_v10  ;;  %809 = vmatpush1.bf16.msra.mxu0 %v2769_v11  ;;  %v2867_v11 = vld [vmem:[#allocation8 + $0x214] ss:$24 sps:$4 sm:$0xff]  }
  0x80   :  { %840 = vmatprep.mubr.bf16.mxu0 %v243_v58  ;;  %810 = vmatprep.subr.bf16.mxu0 %v2774_v12  ;;  %v2838_v58 = vld [vmem:[#allocation8] ss:$24 sps:$4 sm:$0xff]   ;;  %v2865_v12 = vld [vmem:[#allocation8 + $0x210] ss:$24 sps:$4 sm:$0xff]  }
  0x81   :  { %1770 = vmatpush1.bf16.msra.mxu1 %v2817_v42  ;;  %v209_v42 = vsub.s32 4, %v3278_v45 }
  0x82   :  { %1771 = vmatprep.subr.bf16.mxu1 %v2822_v44  ;;  %v213_v44 = vsub.s32 5, %v3278_v45 }
  0x83   :  { %811 = vmatpush1.bf16.msra.mxu0 %v2772_v13  ;;  %v2870_v13 = vld [vmem:[#allocation8 + $0x394] ss:$24 sps:$4 sm:$0xff]  }
  0x84   :  { %812 = vmatprep.subr.bf16.mxu0 %v2777_v14  ;;  %v2868_v14 = vld [vmem:[#allocation8 + $0x390] ss:$24 sps:$4 sm:$0xff]  }
  0x85   :  { %1772 = vmatpush1.bf16.msra.mxu1 %v2820_v46 }
  0x86   :  { %1773 = vmatprep.subr.bf16.mxu1 %v2825_v47 }
  0x87   :  { %813 = vmatpush1.bf16.msra.mxu0 %v2775_v15  ;;  %v2873_v15 = vld [vmem:[#allocation8 + $0x1e4] ss:$24 sps:$4 sm:$0xff]  }
  0x88   :  { %814 = vmatprep.subr.bf16.mxu0 %v2780_v16  ;;  %v2871_v16 = vld [vmem:[#allocation8 + $0x1e0] ss:$24 sps:$4 sm:$0xff]  }
  0x89   :  { %1774 = vmatpush1.bf16.msra.mxu1 %v2823_v48 }
  0x8a   :  { %1775 = vmatprep.subr.bf16.mxu1 %v2828_v49 }
  0x8b   :  { %815 = vmatpush1.bf16.msra.mxu0 %v2778_v17  ;;  %v2876_v17 = vld [vmem:[#allocation8 + $0x364] ss:$24 sps:$4 sm:$0xff]  }
  0x8c   :  { %816 = vmatprep.subr.bf16.mxu0 %v2783_v18  ;;  %v2874_v18 = vld [vmem:[#allocation8 + $0x360] ss:$24 sps:$4 sm:$0xff]  }
  0x8d   :  { %1776 = vmatpush1.bf16.msra.mxu1 %v2826_v50 }
  0x8e   :  { %1777 = vmatprep.subr.bf16.mxu1 %v2831_v51 }
  0x8f   :  { %817 = vmatpush1.bf16.msra.mxu0 %v2781_v19  ;;  %v2879_v19 = vld [vmem:[#allocation8 + $0x1b4] ss:$24 sps:$4 sm:$0xff]  }
  0x90   :  { %818 = vmatprep.subr.bf16.mxu0 %v2786_v20  ;;  %v2882_v20 = vld [vmem:[#allocation8 + $0x334] ss:$24 sps:$4 sm:$0xff]  }
  0x91   :  { %1778 = vmatpush1.bf16.msra.mxu1 %v2829_v52 }
  0x92   :  { %1779 = vmatprep.subr.bf16.mxu1 %v2834_v53 }
  0x93   :  { %819 = vmatpush1.bf16.msra.mxu0 %v2784_v21  ;;  %v2877_v21 = vld [vmem:[#allocation8 + $0x1b0] ss:$24 sps:$4 sm:$0xff]  }
  0x94   :  { %820 = vmatprep.subr.bf16.mxu0 %v2789_v22  ;;  %v2880_v22 = vld [vmem:[#allocation8 + $0x330] ss:$24 sps:$4 sm:$0xff]  }
  0x95   :  { %1780 = vmatpush1.bf16.msra.mxu1 %v2832_v54 }
  0x96   :  { %1781 = vmatprep.subr.bf16.mxu1 %v2837_v55 }
  0x97   :  { %821 = vmatpush1.bf16.msra.mxu0 %v2787_v23  ;;  %v2885_v23 = vld [vmem:[#allocation8 + $0x184] ss:$24 sps:$4 sm:$0xff]  }
  0x98   :  { %822 = vmatprep.subr.bf16.mxu0 %v2792_v24  ;;  %v2888_v24 = vld [vmem:[#allocation8 + $0x304] ss:$24 sps:$4 sm:$0xff]  }
  0x99   :  { %1782 = vmatpush1.bf16.msra.mxu1 %v2835_v56 }
  0x9a   :  { %1783 = vmatprep.subr.bf16.mxu1 %v2840_v57 }
  0x9b   :  { %823 = vmatpush1.bf16.msra.mxu0 %v2790_v25  ;;  %v2883_v25 = vld [vmem:[#allocation8 + $0x180] ss:$24 sps:$4 sm:$0xff]  }
  0x9c   :  { %824 = vmatprep.subr.bf16.mxu0 %v2795_v26  ;;  %v2886_v26 = vld [vmem:[#allocation8 + $0x300] ss:$24 sps:$4 sm:$0xff]  }
  0x9d   :  { %1784 = vmatpush1.bf16.msra.mxu1 %v2838_v58 }
  0x9e   :  { %1785 = vmatprep.subr.bf16.mxu1 %v2843_v59 }
  0x9f   :  { %825 = vmatpush2.bf16.msra.mxu0 %v2793_v27  ;;  %v2891_v27 = vld [vmem:[#allocation8 + $0x15c] ss:$24 sps:$4 sm:$0xff]  }
  0xa0   :  { %826 = vmatprep.subr.bf16.mxu0 %v2798_v28  ;;  %v2894_v28 = vld [vmem:[#allocation8 + $0x45c] ss:$24 sps:$4 sm:$0xff]  }
  0xa1   :  { %1786 = vmatpush2.bf16.msra.mxu1 %v2841_v60 }
  0xa2   :  { %1787 = vmatprep.subr.bf16.mxu1 %v2849_v63  ;;  %v197_v63 = vsub.s32 1, %v3278_v45 }
  0xa3   :  { %827 = vmatpush2.bf16.msra.mxu0 %v2796_v29  ;;  %v3219_v29 = vmov 0  }
  0xa4   :  { %828 = vmatprep.subr.bf16.mxu0 %v2801_v30 }
  0xa5   :  { %1788 = vmatpush2.bf16.msra.mxu1 %v2847_v0  ;;  %v201_v0 = vsub.s32 2, %v3278_v45 }
  0xa6   :  { %1789 = vmatprep.subr.bf16.mxu1 %v2855_v3 }
  0xa7   :  { %829 = vmatpush2.bf16.msra.mxu0 %v2799_v31 }
  0xa8   :  { %830 = vmatprep.subr.bf16.mxu0 %v2804_v32 }
  0xa9   :  { %1790 = vmatpush2.bf16.msra.mxu1 %v2853_v4 }
  0xaa   :  { %1791 = vmatprep.subr.bf16.mxu1 %v2861_v7 }
  0xab   :  { %831 = vmatpush2.bf16.msra.mxu0 %v2802_v33 }
  0xac   :  { %832 = vmatprep.subr.bf16.mxu0 %v2807_v34 }
  0xad   :  { %1792 = vmatpush2.bf16.msra.mxu1 %v2859_v8 }
  0xae   :  { %1793 = vmatprep.subr.bf16.mxu1 %v2867_v11 }
  0xaf   :  { %833 = vmatpush2.bf16.msra.mxu0 %v2805_v35 }
  0xb0   :  { %834 = vmatprep.subr.bf16.mxu0 %v2810_v36 }
  0xb1   :  { %1794 = vmatpush2.bf16.msra.mxu1 %v2865_v12 }
  0xb2   :  { %1795 = vmatprep.subr.bf16.mxu1 %v2873_v15 }
  0xb3   :  { %835 = vmatpush2.bf16.msra.mxu0 %v2808_v37 }
  0xb4   :  { %836 = vmatprep.subr.bf16.mxu0 %v2813_v38  ;;  %v205_v38 = vsub.s32 3, %v3278_v45 }
  0xb5   :  { %1796 = vmatpush2.bf16.msra.mxu1 %v2871_v16  ;;  %v2892_v16 = vld [vmem:[#allocation8 + $0x458] ss:$24 sps:$4 sm:$0xff]  }
  0xb6   :  { %1797 = vmatprep.subr.bf16.mxu1 %v2879_v19  ;;  %v2900_v19 = vld [vmem:[#allocation8 + $0x42c] ss:$24 sps:$4 sm:$0xff]  }
  0xb7   :  { %837 = vmatpush2.bf16.msra.mxu0 %v2811_v39  ;;  %v189_v39 = vld [vmem:[#allocation7] sm:$0x3f] }
  0xb8   :  { %838 = vmatprep.subr.bf16.mxu0 %v2816_v40  ;;  %v206_v40 = vrot.slane %v189_v39, %v205_v38  ;;  %v210_v46 = vrot.slane %v189_v39, %v209_v42  ;;  %v214_v47 = vrot.slane %v189_v39, %v213_v44  ;;  %v202_v4 = vrot.slane %v189_v39, %v201_v0 }
  0xb9   :  { %1798 = vmatpush2.bf16.msra.mxu1 %v2877_v21  ;;  %v2898_v21 = vld [vmem:[#allocation8 + $0x428] ss:$24 sps:$4 sm:$0xff]  }
  0xba   :  { %1799 = vmatprep.subr.bf16.mxu1 %v2885_v23  ;;  %v2906_v23 = vld [vmem:[#allocation8 + $0x3fc] ss:$24 sps:$4 sm:$0xff]  }
  0xbb   :  { %839 = vmatpush2.bf16.msra.mxu0 %v2814_v41 }
  0xbc   :  { %1810 = vmatprep.subr.bf16.mxu0 %v2846_v61 }
  0xbd   :  { %1800 = vmatpush2.bf16.msra.mxu1 %v2883_v25  ;;  %v2904_v25 = vld [vmem:[#allocation8 + $0x3f8] ss:$24 sps:$4 sm:$0xff]  }
  0xbe   :  { %841 = vmatmul.mubr.bf16.vlgmr.msra.gmra.mxu0 %v3281_v10  ;;  %v2862_v10 = vld [vmem:[#allocation8 + $0x3c0] ss:$24 sps:$4 sm:$0xff]   ;;  %1851 = vmatprep.subr.bf16.mxu1 %v2891_v27  ;;  %v2912_v27 = vld [vmem:[#allocation8 + $0x3cc] ss:$24 sps:$4 sm:$0xff]  }
  0xbf   :  { %1811 = vmatpush1.bf16.msra.mxu0 %v2844_v62  ;;  %1842 = vmatprep.mubr.bf16.mxu0 %v3219_v29  ;;  %v193_v62 = vsub.s32 0, %v3278_v45 }
  0xc0   :  { %1812 = vmatprep.subr.bf16.mxu0 %v2852_v1 }
  0xc1   :  { %v194_v1 = vrot.slane %v189_v39, %v193_v62 }
  0xc3   :  { %1813 = vmatpush1.bf16.msra.mxu0 %v2850_v2  ;;  %v198_v2 = vrot.slane %v189_v39, %v197_v63  ;;  %v2922_v39 = vld [vmem:[#allocation8 + $0x368] ss:$24 sps:$4 sm:$0xff]  }
  0xc4   :  { %1814 = vmatprep.subr.bf16.mxu0 %v2858_v5 }
  0xc7   :  { %1815 = vmatpush1.bf16.msra.mxu0 %v2856_v6 }
  0xc8   :  { %1816 = vmatprep.subr.bf16.mxu0 %v2864_v9 }
  0xcb   :  { %1817 = vmatpush1.bf16.msra.mxu0 %v2862_v10 }
  0xcc   :  { %1818 = vmatprep.subr.bf16.mxu0 %v2870_v13  ;;  %v2889_v13 = vld [vmem:[#allocation8 + $0x158] ss:$24 sps:$4 sm:$0xff]  }
  0xcf   :  { %1819 = vmatpush1.bf16.msra.mxu0 %v2868_v14 }
  0xd0   :  { %1820 = vmatprep.subr.bf16.mxu0 %v2876_v17 }
  0xd3   :  { %1821 = vmatpush1.bf16.msra.mxu0 %v2874_v18  ;;  %v2897_v18 = vld [vmem:[#allocation8 + $0x12c] ss:$24 sps:$4 sm:$0xff]  }
  0xd4   :  { %1822 = vmatprep.subr.bf16.mxu0 %v2882_v20  ;;  %v2895_v20 = vld [vmem:[#allocation8 + $0x128] ss:$24 sps:$4 sm:$0xff]  }
  0xd7   :  { %1823 = vmatpush1.bf16.msra.mxu0 %v2880_v22  ;;  %v2903_v22 = vld [vmem:[#allocation8 + $0xfc] ss:$24 sps:$4 sm:$0xff]  }
  0xd8   :  { %1824 = vmatprep.subr.bf16.mxu0 %v2888_v24  ;;  %v2901_v24 = vld [vmem:[#allocation8 + $0xf8] ss:$24 sps:$4 sm:$0xff]  }
  0xdb   :  { %1825 = vmatpush1.bf16.msra.mxu0 %v2886_v26  ;;  %v2909_v26 = vld [vmem:[#allocation8 + $0xcc] ss:$24 sps:$4 sm:$0xff]  }
  0xdc   :  { %1892 = vmatprep.subr.bf16.mxu0 %v2894_v28  ;;  %v2907_v28 = vld [vmem:[#allocation8 + $0xc8] ss:$24 sps:$4 sm:$0xff]  }
 0x13e   :  { %v760_v30 = vpop.f32.mrf.mxu0 }
 0x13f   :  { %v801_v31 = vpop.f32.mrf.mxu1  ;;  %v761_v5 = vadd.f32 %v760_v30, %v194_v1  ;;  %v2910_v30 = vld [vmem:[#allocation8 + $0x3c8] ss:$24 sps:$4 sm:$0xff]  }
 0x140   :  { %v762_v32 = vpop.f32.mrf.mxu0  ;;  %v802_v9 = vadd.f32 %v801_v31, %v202_v4  ;;  %v2915_v31 = vld [vmem:[#allocation8 + $0x9c] ss:$24 sps:$4 sm:$0xff]   ;;  %v2952_v1 = vld [vmem:[#allocation8 + $0x100] ss:$24 sps:$4 sm:$0xff]  }
 0x141   :  { %v803_v33 = vpop.f32.mrf.mxu1  ;;  %v763_v6 = vadd.f32 %v762_v32, %v198_v2  ;;  %v2918_v32 = vld [vmem:[#allocation8 + $0x39c] ss:$24 sps:$4 sm:$0xff]   ;;  %v2957_v2 = vld [vmem:[#allocation8 + $0x24c] ss:$24 sps:$4 sm:$0xff]   ;;  %v2955_v4 = vld [vmem:[#allocation8 + $0x248] ss:$24 sps:$4 sm:$0xff]  }
 0x142   :  { %v764_v34 = vpop.f32.mrf.mxu0  ;;  %v804_v41 = vadd.f32 %v803_v33, %v206_v40  ;;  %v2913_v33 = vld [vmem:[#allocation8 + $0x98] ss:$24 sps:$4 sm:$0xff]   ;;  %v2927_v40 = vld [vmem:[#allocation8 + $0x3c] ss:$24 sps:$4 sm:$0xff]  }
 0x143   :  { %v805_v35 = vpop.f32.mrf.mxu1  ;;  %v2916_v34 = vld [vmem:[#allocation8 + $0x398] ss:$24 sps:$4 sm:$0xff]  }
 0x144   :  { %v765_v36 = vpop.f32.mrf.mxu0  ;;  %v2433_v43 = vmul.f32 -1.442695, %v804_v41  ;;  %v2921_v35 = vld [vmem:[#allocation8 + $0x6c] ss:$24 sps:$4 sm:$0xff]   ;;  %v2930_v41 = vld [vmem:[#allocation8 + $0x33c] ss:$24 sps:$4 sm:$0xff]  }
 0x145   :  { %v806_v37 = vpop.f32.mrf.mxu1  ;;  %v2924_v36 = vld [vmem:[#allocation8 + $0x36c] ss:$24 sps:$4 sm:$0xff]  }
 0x146   :  { %3057 = vpow2.f32 %v2433_v43  ;;  %v2919_v37 = vld [vmem:[#allocation8 + $0x68] ss:$24 sps:$4 sm:$0xff]   ;;  %v2925_v43 = vld [vmem:[#allocation8 + $0x38] ss:$24 sps:$4 sm:$0xff]  }
 0x153   :  { %v3058_v56 = vpop.eup %3057 }
 0x154   :  { %v858_v57 = vadd.f32 1.0, %v3058_v56  ;;  %v2948_v56 = vld [vmem:[#allocation8 + $0x134] ss:$24 sps:$4 sm:$0xff]  }
 0x17e   :  { %v842_v48 = vpop.f32.mrf.mxu0 }
 0x17f   :  { %v843_v49 = vadd.f32 %v842_v48, %v210_v46  ;;  %v2928_v46 = vld [vmem:[#allocation8 + $0x338] ss:$24 sps:$4 sm:$0xff]   ;;  %v2936_v48 = vld [vmem:[#allocation8 + $0x30c] ss:$24 sps:$4 sm:$0xff]  }
 0x180   :  { %v844_v50 = vpop.f32.mrf.mxu0 }
 0x181   :  { %v2434_v51 = vmul.f32 -1.442695, %v843_v49  ;;  %v845_v52 = vadd.f32 %v844_v50, %v214_v47  ;;  %v2933_v47 = vld [vmem:[#allocation8 + $0xc] ss:$24 sps:$4 sm:$0xff]   ;;  %v2931_v49 = vld [vmem:[#allocation8 + $0x8] ss:$24 sps:$4 sm:$0xff]  }
 0x182   :  { %v846_v53 = vpop.f32.mrf.mxu0  ;;  %v2934_v50 = vld [vmem:[#allocation8 + $0x308] ss:$24 sps:$4 sm:$0xff]  }
 0x183   :  { %3059 = vpow2.f32 %v2434_v51  ;;  %v2435_v54 = vmul.f32 -1.442695, %v845_v52  ;;  %v2939_v51 = vld [vmem:[#allocation8 + $0x2dc] ss:$24 sps:$4 sm:$0xff]   ;;  %v2937_v53 = vld [vmem:[#allocation8 + $0x2d8] ss:$24 sps:$4 sm:$0xff]  }
 0x184   :  { %v847_v55 = vpop.f32.mrf.mxu0  ;;  %v2942_v52 = vld [vmem:[#allocation8 + $0x164] ss:$24 sps:$4 sm:$0xff]  }
 0x185   :  { %3061 = vpow2.f32 %v2435_v54  ;;  %v2940_v54 = vld [vmem:[#allocation8 + $0x160] ss:$24 sps:$4 sm:$0xff]   ;;  %v2945_v55 = vld [vmem:[#allocation8 + $0x2ac] ss:$24 sps:$4 sm:$0xff]  }
 0x186   :  { %3063 = vrcp.f32 %v858_v57  ;;  %v2943_v57 = vld [vmem:[#allocation8 + $0x2a8] ss:$24 sps:$4 sm:$0xff]  }
 0x190   :  { %v3060_v58 = vpop.eup %3059 }
 0x191   :  { %v859_v59 = vadd.f32 1.0, %v3060_v58  ;;  %v2946_v58 = vld [vmem:[#allocation8 + $0x130] ss:$24 sps:$4 sm:$0xff]  }
 0x192   :  { %v3062_v60 = vpop.eup %3061 }
 0x193   :  { %3065 = vrcp.f32 %v859_v59  ;;  %v860_v61 = vadd.f32 1.0, %v3062_v60  ;;  %v3064_v3 = vpop.eup %3063  ;;  %v2951_v59 = vld [vmem:[#allocation8 + $0x27c] ss:$24 sps:$4 sm:$0xff]  }
 0x194   :  { %v867_v8 = vmul.f32 %v3064_v3, %v761_v5  ;;  %v2954_v60 = vld [vmem:[#allocation8 + $0x104] ss:$24 sps:$4 sm:$0xff]   ;;  %v2960_v3 = vld [vmem:[#allocation8 + $0xd4] ss:$24 sps:$4 sm:$0xff]   ;;  %v2958_v5 = vld [vmem:[#allocation8 + $0xd0] ss:$24 sps:$4 sm:$0xff]  }
 0x195   :  { %3067 = vrcp.f32 %v860_v61  ;;  %v2949_v61 = vld [vmem:[#allocation8 + $0x278] ss:$24 sps:$4 sm:$0xff]  }
 0x196   :  { %v3307_v15 = vpack.c.bf16 %v867_v8, %v867_v8  ;;  %v2961_v8 = vld [vmem:[#allocation8 + $0x218] ss:$24 sps:$4 sm:$0xff]  }
 0x1a0   :  { %v3066_v7 = vpop.eup %3065 }
 0x1a1   :  { %v868_v10 = vmul.f32 %v3066_v7, %v763_v6  ;;  %v2963_v6 = vld [vmem:[#allocation8 + $0x21c] ss:$24 sps:$4 sm:$0xff]  }
 0x1a2   :  { %v3068_v11 = vpop.eup %3067  ;;  %v2966_v7 = vld [vmem:[#allocation8 + $0xa4] ss:$24 sps:$4 sm:$0xff]  }
 0x1a3   :  { %v3305_v12 = vpack.c.bf16 %v868_v10, %v868_v10  ;;  %v869_v14 = vmul.f32 %v3068_v11, %v802_v9  ;;  %v2964_v9 = vld [vmem:[#allocation8 + $0xa0] ss:$24 sps:$4 sm:$0xff]   ;;  %v2969_v10 = vld [vmem:[#allocation8 + $0x1ec] ss:$24 sps:$4 sm:$0xff]  }
 0x1a4   :  { %v2972_v11 = vld [vmem:[#allocation8 + $0x74] ss:$24 sps:$4 sm:$0xff]  }
 0x1a5   :  { %1801 = vmatprep.mubr.bf16.mxu1 %v3305_v12  ;;  %v3310_v17 = vpack.c.bf16 %v869_v14, %v869_v14  ;;  %v2975_v14 = vld [vmem:[#allocation8 + $0x1bc] ss:$24 sps:$4 sm:$0xff]  }
 0x1a6   :  { %1802 = vmatmul.mubr.bf16.vlgmr.msra.gmra.mxu1 %v3307_v15 }
 0x1a7   :  { %1852 = vmatpush1.bf16.msra.mxu1 %v2889_v13  ;;  %1843 = vmatmul.mubr.bf16.vlgmr.msra.gmra.mxu0 %v3310_v17  ;;  %v2970_v13 = vld [vmem:[#allocation8 + $0x70] ss:$24 sps:$4 sm:$0xff]  }
 0x1a8   :  { %1883 = vmatprep.mubr.bf16.mxu1 %v3305_v12  ;;  %1893 = vmatpush1.bf16.msra.mxu0 %v2892_v16  ;;  %v2978_v16 = vld [vmem:[#allocation8 + $0x44] ss:$24 sps:$4 sm:$0xff]  }
 0x1a9   :  { %1853 = vmatprep.subr.bf16.mxu1 %v2897_v18  ;;  %1894 = vmatprep.subr.bf16.mxu0 %v2900_v19  ;;  %v2973_v18 = vld [vmem:[#allocation8 + $0x1b8] ss:$24 sps:$4 sm:$0xff]  }
 0x1aa   :  { %1924 = vmatprep.mubr.bf16.mxu0 %v3219_v29  ;;  %v2976_v19 = vld [vmem:[#allocation8 + $0x40] ss:$24 sps:$4 sm:$0xff]  }
 0x1ab   :  { %1854 = vmatpush1.bf16.msra.mxu1 %v2895_v20  ;;  %v2981_v20 = vld [vmem:[#allocation8 + $0x18c] ss:$24 sps:$4 sm:$0xff]  }
 0x1ac   :  { %1895 = vmatpush1.bf16.msra.mxu0 %v2898_v21  ;;  %1855 = vmatprep.subr.bf16.mxu1 %v2903_v22  ;;  %v2984_v21 = vld [vmem:[#allocation8 + $0x14] ss:$24 sps:$4 sm:$0xff]   ;;  %v2979_v22 = vld [vmem:[#allocation8 + $0x188] ss:$24 sps:$4 sm:$0xff]  }
 0x1ad   :  { %1896 = vmatprep.subr.bf16.mxu0 %v2906_v23  ;;  %v2982_v23 = vld [vmem:[#allocation8 + $0x10] ss:$24 sps:$4 sm:$0xff]  }
 0x1af   :  { %1856 = vmatpush1.bf16.msra.mxu1 %v2901_v24  ;;  %v2987_v24 = vld [vmem:[#allocation8 + $0x464] ss:$24 sps:$4 sm:$0xff]  }
 0x1b0   :  { %1897 = vmatpush1.bf16.msra.mxu0 %v2904_v25  ;;  %1857 = vmatprep.subr.bf16.mxu1 %v2909_v26  ;;  %v2990_v25 = vld [vmem:[#allocation8 + $0x2e4] ss:$24 sps:$4 sm:$0xff]   ;;  %v2985_v26 = vld [vmem:[#allocation8 + $0x460] ss:$24 sps:$4 sm:$0xff]  }
 0x1b1   :  { %1898 = vmatprep.subr.bf16.mxu0 %v2912_v27  ;;  %v2988_v27 = vld [vmem:[#allocation8 + $0x2e0] ss:$24 sps:$4 sm:$0xff]  }
 0x1b3   :  { %1858 = vmatpush1.bf16.msra.mxu1 %v2907_v28  ;;  %v2993_v28 = vld [vmem:[#allocation8 + $0x434] ss:$24 sps:$4 sm:$0xff]  }
 0x1b4   :  { %1899 = vmatpush1.bf16.msra.mxu0 %v2910_v30  ;;  %1859 = vmatprep.subr.bf16.mxu1 %v2915_v31  ;;  %v2996_v30 = vld [vmem:[#allocation8 + $0x2b4] ss:$24 sps:$4 sm:$0xff]   ;;  %v2991_v31 = vld [vmem:[#allocation8 + $0x430] ss:$24 sps:$4 sm:$0xff]  }
 0x1b5   :  { %1900 = vmatprep.subr.bf16.mxu0 %v2918_v32  ;;  %v2994_v32 = vld [vmem:[#allocation8 + $0x2b0] ss:$24 sps:$4 sm:$0xff]  }
 0x1b7   :  { %1860 = vmatpush1.bf16.msra.mxu1 %v2913_v33  ;;  %v2999_v33 = vld [vmem:[#allocation8 + $0x404] ss:$24 sps:$4 sm:$0xff]  }
 0x1b8   :  { %1901 = vmatpush1.bf16.msra.mxu0 %v2916_v34  ;;  %1861 = vmatprep.subr.bf16.mxu1 %v2921_v35  ;;  %v3002_v34 = vld [vmem:[#allocation8 + $0x284] ss:$24 sps:$4 sm:$0xff]   ;;  %v2997_v35 = vld [vmem:[#allocation8 + $0x400] ss:$24 sps:$4 sm:$0xff]  }
 0x1b9   :  { %1902 = vmatprep.subr.bf16.mxu0 %v2924_v36  ;;  %v3000_v36 = vld [vmem:[#allocation8 + $0x280] ss:$24 sps:$4 sm:$0xff]  }
 0x1bb   :  { %1862 = vmatpush1.bf16.msra.mxu1 %v2919_v37  ;;  %v3005_v37 = vld [vmem:[#allocation8 + $0x3d4] ss:$24 sps:$4 sm:$0xff]  }
 0x1bc   :  { %1903 = vmatpush1.bf16.msra.mxu0 %v2922_v39  ;;  %1863 = vmatprep.subr.bf16.mxu1 %v2927_v40  ;;  %v3008_v39 = vld [vmem:[#allocation8 + $0x254] ss:$24 sps:$4 sm:$0xff]   ;;  %v3003_v40 = vld [vmem:[#allocation8 + $0x3d0] ss:$24 sps:$4 sm:$0xff]  }
 0x1bd   :  { %1904 = vmatprep.subr.bf16.mxu0 %v2930_v41  ;;  %v3006_v41 = vld [vmem:[#allocation8 + $0x250] ss:$24 sps:$4 sm:$0xff]  }
 0x1bf   :  { %1864 = vmatpush1.bf16.msra.mxu1 %v2925_v43  ;;  %v3014_v43 = vld [vmem:[#allocation8 + $0x224] ss:$24 sps:$4 sm:$0xff]  }
 0x1c0   :  { %1905 = vmatpush1.bf16.msra.mxu0 %v2928_v46  ;;  %1865 = vmatprep.subr.bf16.mxu1 %v2933_v47  ;;  %v3009_v46 = vld [vmem:[#allocation8 + $0x3a0] ss:$24 sps:$4 sm:$0xff]  }
 0x1c1   :  { %1906 = vmatprep.subr.bf16.mxu0 %v2936_v48  ;;  %v3012_v47 = vld [vmem:[#allocation8 + $0x220] ss:$24 sps:$4 sm:$0xff]   ;;  %v3017_v48 = vld [vmem:[#allocation8 + $0x374] ss:$24 sps:$4 sm:$0xff]  }
 0x1c3   :  { %1866 = vmatpush1.bf16.msra.mxu1 %v2931_v49  ;;  %v3020_v49 = vld [vmem:[#allocation8 + $0x1f4] ss:$24 sps:$4 sm:$0xff]  }
 0x1c4   :  { %1907 = vmatpush1.bf16.msra.mxu0 %v2934_v50  ;;  %1867 = vmatprep.subr.bf16.mxu1 %v2939_v51  ;;  %v3015_v50 = vld [vmem:[#allocation8 + $0x370] ss:$24 sps:$4 sm:$0xff]  }
 0x1c5   :  { %1933 = vmatprep.subr.bf16.mxu0 %v2942_v52  ;;  %v3018_v51 = vld [vmem:[#allocation8 + $0x1f0] ss:$24 sps:$4 sm:$0xff]   ;;  %v3023_v52 = vld [vmem:[#allocation8 + $0x344] ss:$24 sps:$4 sm:$0xff]  }
 0x1c7   :  { %1868 = vmatpush2.bf16.msra.mxu1 %v2937_v53  ;;  %1925 = vmatmul.mubr.bf16.vlgmr.msra.gmra.mxu0 %v3310_v17  ;;  %v3026_v53 = vld [vmem:[#allocation8 + $0x1c4] ss:$24 sps:$4 sm:$0xff]  }
 0x1c8   :  { %1934 = vmatpush1.bf16.msra.mxu0 %v2940_v54  ;;  %1965 = vmatprep.mubr.bf16.mxu0 %v3305_v12  ;;  %v2967_v12 = vld [vmem:[#allocation8 + $0x1e8] ss:$24 sps:$4 sm:$0xff]  }
 0x1c9   :  { %1869 = vmatprep.subr.bf16.mxu1 %v2945_v55  ;;  %1935 = vmatprep.subr.bf16.mxu0 %v2948_v56  ;;  %v3021_v54 = vld [vmem:[#allocation8 + $0x340] ss:$24 sps:$4 sm:$0xff]   ;;  %v3029_v56 = vld [vmem:[#allocation8 + $0x314] ss:$24 sps:$4 sm:$0xff]  }
 0x1ca   :  { %v3024_v55 = vld [vmem:[#allocation8 + $0x1c0] ss:$24 sps:$4 sm:$0xff]  }
 0x1cb   :  { %1870 = vmatpush2.bf16.msra.mxu1 %v2943_v57  ;;  %v3032_v57 = vld [vmem:[#allocation8 + $0x194] ss:$24 sps:$4 sm:$0xff]  }
 0x1cc   :  { %1936 = vmatpush1.bf16.msra.mxu0 %v2946_v58  ;;  %1871 = vmatprep.subr.bf16.mxu1 %v2951_v59  ;;  %v3027_v58 = vld [vmem:[#allocation8 + $0x310] ss:$24 sps:$4 sm:$0xff]  }
 0x1cd   :  { %1937 = vmatprep.subr.bf16.mxu0 %v2954_v60  ;;  %v3030_v59 = vld [vmem:[#allocation8 + $0x190] ss:$24 sps:$4 sm:$0xff]   ;;  %v3033_v60 = vld [vmem:[#allocation10 + $0x78] sm:$0xff]  }
 0x1cf   :  { %1872 = vmatpush2.bf16.msra.mxu1 %v2949_v61  ;;  %v3034_v61 = vld [vmem:[#allocation10 + $0x38] sm:$0xff]  }
 0x1d0   :  { %1938 = vmatpush1.bf16.msra.mxu0 %v2952_v1  ;;  %1873 = vmatprep.subr.bf16.mxu1 %v2957_v2  ;;  %v3035_v1 = vld [vmem:[#allocation10 + $0xb8] sm:$0xff]   ;;  %v3220_v2 = vmov 0.0  }
 0x1d1   :  { %1939 = vmatprep.subr.bf16.mxu0 %v2960_v3  ;;  %v3036_v3 = vld [vmem:[#allocation10 + $0x70] sm:$0xff]  }
 0x1d3   :  { %1874 = vmatpush2.bf16.msra.mxu1 %v2955_v4  ;;  %v3037_v4 = vld [vmem:[#allocation10 + $0x30] sm:$0xff]  }
 0x1d4   :  { %1940 = vmatpush1.bf16.msra.mxu0 %v2958_v5  ;;  %1875 = vmatprep.subr.bf16.mxu1 %v2963_v6  ;;  %v3038_v5 = vld [vmem:[#allocation10 + $0xb0] sm:$0xff]   ;;  %v3040_v6 = vld [vmem:[#allocation10 + $0x28] sm:$0xff]  }
 0x1d5   :  { %1941 = vmatprep.subr.bf16.mxu0 %v2966_v7  ;;  %v3042_v7 = vld [vmem:[#allocation10 + $0x60] sm:$0xff]  }
 0x1d7   :  { %1876 = vmatpush2.bf16.msra.mxu1 %v2961_v8  ;;  %v3043_v8 = vld [vmem:[#allocation10 + $0x20] sm:$0xff]  }
 0x1d8   :  { %1942 = vmatpush1.bf16.msra.mxu0 %v2964_v9  ;;  %1877 = vmatprep.subr.bf16.mxu1 %v2969_v10  ;;  %v3044_v9 = vld [vmem:[#allocation10 + $0xa0] sm:$0xff]   ;;  %v3329_v10 = vld [vmem:[%s3364_s4] sm:$0x3f] }
 0x1d9   :  { %1943 = vmatprep.subr.bf16.mxu0 %v2972_v11  ;;  %v3045_v11 = vld [vmem:[#allocation10 + $0x58] sm:$0xff]  }
 0x1db   :  { %1878 = vmatpush2.bf16.msra.mxu1 %v2967_v12  ;;  %v3046_v12 = vld [vmem:[#allocation10 + $0x18] sm:$0xff]  }
 0x1dc   :  { %1944 = vmatpush1.bf16.msra.mxu0 %v2970_v13  ;;  %1879 = vmatprep.subr.bf16.mxu1 %v2975_v14  ;;  %v3047_v13 = vld [vmem:[#allocation10 + $0x98] sm:$0xff]   ;;  %v3048_v14 = vld [vmem:[#allocation10 + $0x50] sm:$0xff]  }
 0x1dd   :  { %1945 = vmatprep.subr.bf16.mxu0 %v2978_v16  ;;  %v3049_v16 = vld [vmem:[#allocation10 + $0x10] sm:$0xff]  }
 0x1df   :  { %1880 = vmatpush2.bf16.msra.mxu1 %v2973_v18  ;;  %v1022_v18 = vrot.slane %v3329_v10, %v193_v62 }
 0x1e0   :  { %1946 = vmatpush1.bf16.msra.mxu0 %v2976_v19  ;;  %1881 = vmatprep.subr.bf16.mxu1 %v2981_v20  ;;  %v3050_v19 = vld [vmem:[#allocation10 + $0x90] sm:$0xff]   ;;  %v3051_v20 = vld [vmem:[#allocation10 + $0x48] sm:$0xff]  }
 0x1e1   :  { %1947 = vmatprep.subr.bf16.mxu0 %v2984_v21  ;;  %v1026_v21 = vrot.slane %v3329_v10, %v197_v63 }
 0x1e3   :  { %1882 = vmatpush2.bf16.msra.mxu1 %v2979_v22 }
 0x1e4   :  { %1948 = vmatpush1.bf16.msra.mxu0 %v2982_v23  ;;  %1974 = vmatprep.subr.bf16.mxu1 %v2987_v24  ;;  %v3052_v23 = vld [vmem:[#allocation10 + $0x8] sm:$0xff]  }
 0x1e5   :  { %1949 = vmatprep.subr.bf16.mxu0 %v2990_v25 }
 0x1e6   :  { %1884 = vmatmul.mubr.bf16.vlgmr.msra.gmra.mxu1 %v3307_v15 }
 0x1e7   :  { %1975 = vmatpush1.bf16.msra.mxu1 %v2985_v26  ;;  %2006 = vmatprep.mubr.bf16.mxu1 %v3219_v29  ;;  %v3011_v29 = vld [vmem:[#allocation8 + $0x3a4] ss:$24 sps:$4 sm:$0xff]   ;;  %v3053_v26 = vld [vmem:[#allocation10 + $0x88] sm:$0xff]  }
 0x1e8   :  { %1950 = vmatpush2.bf16.msra.mxu0 %v2988_v27  ;;  %1976 = vmatprep.subr.bf16.mxu1 %v2993_v28  ;;  %v3054_v27 = vld [vmem:[#allocation10 + $0x40] sm:$0xff]  }
 0x1e9   :  { %1951 = vmatprep.subr.bf16.mxu0 %v2996_v30 }
 0x1eb   :  { %1977 = vmatpush1.bf16.msra.mxu1 %v2991_v31 }
 0x1ec   :  { %1952 = vmatpush2.bf16.msra.mxu0 %v2994_v32  ;;  %1978 = vmatprep.subr.bf16.mxu1 %v2999_v33  ;;  %v3055_v33 = vld [vmem:[#allocation10] sm:$0xff]  }
 0x1ed   :  { %1953 = vmatprep.subr.bf16.mxu0 %v3002_v34 }
 0x1ef   :  { %1979 = vmatpush1.bf16.msra.mxu1 %v2997_v35  ;;  %v3056_v35 = vld [vmem:[#allocation10 + $0x80] sm:$0xff]  }
 0x1f0   :  { %1954 = vmatpush2.bf16.msra.mxu0 %v3000_v36  ;;  %1980 = vmatprep.subr.bf16.mxu1 %v3005_v37 }
 0x1f1   :  { %1955 = vmatprep.subr.bf16.mxu0 %v3008_v39 }
 0x1f3   :  { %1981 = vmatpush1.bf16.msra.mxu1 %v3003_v40 }
 0x1f4   :  { %1956 = vmatpush2.bf16.msra.mxu0 %v3006_v41  ;;  %1982 = vmatprep.subr.bf16.mxu1 %v3011_v29 }
 0x1f5   :  { %1957 = vmatprep.subr.bf16.mxu0 %v3014_v43  ;;  %v1030_v43 = vrot.slane %v3329_v10, %v201_v0  ;;  %v1038_v0 = vrot.slane %v3329_v10, %v209_v42 }
 0x1f7   :  { %1983 = vmatpush1.bf16.msra.mxu1 %v3009_v46  ;;  %v1034_v46 = vrot.slane %v3329_v10, %v205_v38  ;;  %v1042_v38 = vrot.slane %v3329_v10, %v213_v44 }
 0x1f8   :  { %1958 = vmatpush2.bf16.msra.mxu0 %v3012_v47  ;;  %1984 = vmatprep.subr.bf16.mxu1 %v3017_v48 }
 0x1f9   :  { %1959 = vmatprep.subr.bf16.mxu0 %v3020_v49 }
 0x1fb   :  { %1985 = vmatpush1.bf16.msra.mxu1 %v3015_v50 }
 0x1fc   :  { %1960 = vmatpush2.bf16.msra.mxu0 %v3018_v51  ;;  %1986 = vmatprep.subr.bf16.mxu1 %v3023_v52 }
 0x1fd   :  { %1961 = vmatprep.subr.bf16.mxu0 %v3026_v53 }
 0x1ff   :  { %1987 = vmatpush1.bf16.msra.mxu1 %v3021_v54 }
 0x200   :  { %1962 = vmatpush2.bf16.msra.mxu0 %v3024_v55  ;;  %1988 = vmatprep.subr.bf16.mxu1 %v3029_v56 }
 0x201   :  { %1963 = vmatprep.subr.bf16.mxu0 %v3032_v57 }
 0x203   :  { %1989 = vmatpush1.bf16.msra.mxu1 %v3027_v58 }
 0x204   :  { %1964 = vmatpush2.bf16.msra.mxu0 %v3030_v59  ;;  %2608 = vmatprep.subr.bf16.mxu1 %v3033_v60 }
 0x205   :  { %2639 = vmatprep.subr.bf16.mxu0 %v3220_v2 }
 0x206   :  { %2007 = vmatmul.mubr.bf16.vlgmr.msra.gmra.mxu1 %v3310_v17  ;;  %v3039_v17 = vld [vmem:[#allocation10 + $0x68] sm:$0xff]  }
 0x207   :  { %1966 = vmatmul.mubr.bf16.vlgmr.msra.gmra.mxu0 %v3307_v15  ;;  %2609 = vmatpush3.bf16.msra.mxu1 %v3034_v61  ;;  %v3041_v15 = vld [vmem:[#allocation10 + $0xa8] sm:$0xff]  }
 0x208   :  { %2640 = vmatpush3.bf16.msra.mxu0 %v3035_v1  ;;  %2610 = vmatprep.subr.bf16.mxu1 %v3036_v3 }
 0x209   :  { %2641 = vmatprep.subr.bf16.mxu0 %v3220_v2  ;;  %2655 = vmatprep.mubr.msk.bf16.mxu0 %vm3221_vm0, %v3220_v2 }
 0x20b   :  { %2611 = vmatpush3.bf16.msra.mxu1 %v3037_v4 }
 0x20c   :  { %2642 = vmatpush3.bf16.msra.mxu0 %v3038_v5  ;;  %2612 = vmatprep.subr.bf16.mxu1 %v3039_v17 }
 0x20d   :  { %2643 = vmatprep.subr.bf16.mxu0 %v3220_v2 }
 0x20f   :  { %2613 = vmatpush3.bf16.msra.mxu1 %v3040_v6 }
 0x210   :  { %2644 = vmatpush3.bf16.msra.mxu0 %v3041_v15  ;;  %2614 = vmatprep.subr.bf16.mxu1 %v3042_v7 }
 0x211   :  { %2645 = vmatprep.subr.bf16.mxu0 %v3220_v2 }
 0x213   :  { %2615 = vmatpush3.bf16.msra.mxu1 %v3043_v8 }
 0x214   :  { %2646 = vmatpush3.bf16.msra.mxu0 %v3044_v9  ;;  %2616 = vmatprep.subr.bf16.mxu1 %v3045_v11 }
 0x215   :  { %2647 = vmatprep.subr.bf16.mxu0 %v3220_v2 }
 0x217   :  { %2617 = vmatpush3.bf16.msra.mxu1 %v3046_v12 }
 0x218   :  { %2648 = vmatpush3.bf16.msra.mxu0 %v3047_v13  ;;  %2618 = vmatprep.subr.bf16.mxu1 %v3048_v14 }
 0x219   :  { %2649 = vmatprep.subr.bf16.mxu0 %v3220_v2 }
 0x21b   :  { %2619 = vmatpush3.bf16.msra.mxu1 %v3049_v16 }
 0x21c   :  { %2650 = vmatpush3.bf16.msra.mxu0 %v3050_v19  ;;  %2620 = vmatprep.subr.bf16.mxu1 %v3051_v20 }
 0x21d   :  { %2651 = vmatprep.subr.bf16.mxu0 %v3220_v2 }
 0x21f   :  { %2621 = vmatpush3.bf16.msra.mxu1 %v3052_v23  ;;  %v2583_v23 = vld [vmem:[%s3366_s6] ss:$0 sm:$0xff] }
 0x220   :  { %2652 = vmatpush3.bf16.msra.mxu0 %v3053_v26  ;;  %2622 = vmatprep.subr.bf16.mxu1 %v3054_v27 }
 0x221   :  { %2653 = vmatprep.subr.bf16.mxu0 %v3220_v2 }
 0x223   :  { %2623 = vmatpush3.bf16.msra.mxu1 %v3055_v33 }
 0x224   :  { %2654 = vmatpush3.bf16.msra.mxu0 %v3056_v35 }
 0x266   :  { %v1803_v22 = vpop.f32.mrf.mxu1 }
 0x267   :  { %v1804_v24 = vadd.f32 %v1803_v22, %v1022_v18  ;;  %v1844_v25 = vpop.f32.mrf.mxu0 }
 0x268   :  { %v1805_v62 = vpop.f32.mrf.mxu1 }
 0x269   :  { %v1845_v28 = vadd.f32 %v1844_v25, %v1804_v24  ;;  %v1806_v30 = vadd.f32 %v1805_v62, %v1026_v21  ;;  %v1846_v31 = vpop.f32.mrf.mxu0 }
 0x26a   :  { %v1807_v32 = vpop.f32.mrf.mxu1 }
 0x26b   :  { %v1847_v34 = vadd.f32 %v1846_v31, %v1806_v30  ;;  %v1848_v63 = vpop.f32.mrf.mxu0 }
 0x26c   :  { %v1808_v36 = vpop.f32.mrf.mxu1 }
 0x26d   :  { %v1849_v37 = vpop.f32.mrf.mxu0 }
 0x287   :  { %v1926_v39 = vpop.f32.mrf.mxu0 }
 0x289   :  { %v1928_v40 = vpop.f32.mrf.mxu0 }
 0x28b   :  { %v1930_v41 = vpop.f32.mrf.mxu0 }
 0x28d   :  { %v1931_v29 = vpop.f32.mrf.mxu0 }
 0x2a6   :  { %v1885_v47 = vpop.f32.mrf.mxu1 }
 0x2a7   :  { %v1886_v48 = vadd.f32 %v1885_v47, %v1030_v43 }
 0x2a8   :  { %v1887_v49 = vpop.f32.mrf.mxu1 }
 0x2a9   :  { %v1927_v50 = vadd.f32 %v1926_v39, %v1886_v48  ;;  %v1888_v51 = vadd.f32 %v1887_v49, %v1034_v46 }
 0x2aa   :  { %v1889_v52 = vpop.f32.mrf.mxu1 }
 0x2ab   :  { %v1929_v53 = vadd.f32 %v1928_v40, %v1888_v51 }
 0x2ac   :  { %v1890_v54 = vpop.f32.mrf.mxu1 }
 0x2ad   :  { %v2580_v55 = vmul.f32 -1.442695, %v1929_v53 }
 0x2af   :  { %3069 = vpow2.f32 %v2580_v55 }
 0x2bc   :  { %v3070_v56 = vpop.eup %3069 }
 0x2bd   :  { %v2024_v57 = vadd.f32 1.0, %v3070_v56 }
 0x2bf   :  { %3071 = vrcp.f32 %v2024_v57 }
 0x2c6   :  { %v2008_v58 = vpop.f32.mrf.mxu1 }
 0x2c7   :  { %v1967_v59 = vpop.f32.mrf.mxu0 }
 0x2c8   :  { %v1968_v60 = vadd.f32 %v1967_v59, %v1038_v0  ;;  %v2010_v61 = vpop.f32.mrf.mxu1 }
 0x2c9   :  { %v1969_v1 = vpop.f32.mrf.mxu0 }
 0x2ca   :  { %v2009_v2 = vadd.f32 %v2008_v58, %v1968_v60  ;;  %v1970_v3 = vadd.f32 %v1969_v1, %v1042_v38  ;;  %v2012_v4 = vpop.f32.mrf.mxu1 }
 0x2cb   :  { %v1971_v5 = vpop.f32.mrf.mxu0 }
 0x2cc   :  { %v3072_v17 = vpop.eup %3071  ;;  %v2581_v6 = vmul.f32 -1.442695, %v2009_v2  ;;  %v2011_v15 = vadd.f32 %v2010_v61, %v1970_v3  ;;  %v2013_v7 = vpop.f32.mrf.mxu1 }
 0x2cd   :  { %v1972_v8 = vpop.f32.mrf.mxu0  ;;  %v2033_v9 = vmul.f32 %v3072_v17, %v1845_v28 }
 0x2ce   :  { %3073 = vpow2.f32 %v2581_v6  ;;  %v2582_v42 = vmul.f32 -1.442695, %v2011_v15 }
 0x2cf   :  { %v2036_v19 = vpack.c.bf16 %v2033_v9, %v2033_v9 }
 0x2d0   :  { %3075 = vpow2.f32 %v2582_v42 }
 0x2db   :  { %v3074_v45 = vpop.eup %3073 }
 0x2dc   :  { %v2025_v11 = vadd.f32 1.0, %v3074_v45 }
 0x2dd   :  { %v3076_v44 = vpop.eup %3075 }
 0x2de   :  { %3077 = vrcp.f32 %v2025_v11  ;;  %v2026_v10 = vadd.f32 1.0, %v3076_v44 }
 0x2e0   :  { %3079 = vrcp.f32 %v2026_v10 }
 0x2eb   :  { %v3078_v12 = vpop.eup %3077 }
 0x2ec   :  { %v2034_v13 = vmul.f32 %v3078_v12, %v1847_v34 }
 0x2ed   :  { %v3080_v14 = vpop.eup %3079 }
 0x2ee   :  { %v2037_v16 = vpack.c.bf16 %v2034_v13, %v2034_v13  ;;  %v2035_v18 = vmul.f32 %v3080_v14, %v1927_v50 }
 0x2f0   :  { %2270 = vmatprep.mubr.bf16.mxu1 %v2037_v16  ;;  %v2038_v20 = vpack.c.bf16 %v2035_v18, %v2035_v18 }
 0x2f1   :  { %2271 = vmatmul.mubr.bf16.vlgmr.msra.gmra.mxu1 %v2036_v19 }
 0x2f2   :  { %2656 = vmatmul.mubr.bf16.vlgmr.msra.gmra.mxu0 %v2038_v20 }
 0x3b1   :  { %v2624_v21 = vpop.f32.mrf.mxu1 }
 0x3b2   :  { %v2312_v22 = vpop.f32.mrf.mxu0 }
 0x3b3   :  { %v2625_v24 = vpop.f32.mrf.mxu1 }
 0x3b4   :  { %v2626_v25 = vadd.f32 %v2625_v24, %v2624_v21  ;;  %v2657_v26 = vpop.f32.mrf.mxu0 }
 0x3b5   :  { %v2627_v27 = vpop.f32.mrf.mxu1 }
 0x3b6   :  { %v2273_v62 = vadd.f32 %v2626_v25, %v2583_v23  ;;  %v2315_v28 = vpop.f32.mrf.mxu0 }
 0x3b7   :  { %v2628_v30 = vpop.f32.mrf.mxu1 }
 0x3b8   :  { %v2658_v31 = vpop.f32.mrf.mxu0  ;;  %v2313_v32 = vadd.f32 %v2312_v22, %v2273_v62 }
 0x3ba   :  { %2318 = vst [vmem:[#allocation11] sm:$0x3] %v2313_v32 }
 0x3bb   :  { %3192 = shalt.err (!%p3189_p1)
}
 0x3bc   :  { %2328 = dma.vmem_to_hbm [thread:$0]  %s2326_s29, 32, %s3367_s7, [#allocation4]  }
 0x3bd   :  { %3207 = dma.done.wait [#allocation4], 32  }
 0x3be   :  { %3208 = vsyncadd [#allocation4], 4294967264 }
 0x3bf   :  { %2332 = vsyncpa [#allocation3], 1 }
 0x3c0   :  { %2333 = vsyncpa [#allocation6], 1 }
 0x3c1   :  { %2334 = vsyncpa [#allocation9], 1 }
 0x3c2   :  { %2335 = vsyncpa [#allocation4], 1 }

</bundles_post_ra>
